<compile_context>
chip_gen: v6e
topology: v6e:2x2x1
jax: 0.10.0
libtpu: 0.0.40
codegen_flags: <defaults>
</compile_context>

<pallas_src>
import jax
import jax.numpy as jnp
from jax import lax
from jax.experimental import pallas as pl
from jax.experimental.pallas import tpu as pltpu

Z_DIM = 64
H1, H2, H3 = 128, 256, 512
OUT = 28 * 28            # 784 logical output features
BN_EPS = 0.8
NEG_SLOPE = 0.2

LANE = 128
SUBLANE = 8


def _round_up(n, m):
    return ((n + m - 1) // m) * m


Z_PAD = _round_up(Z_DIM, LANE)    # 128: lane-dense K for the first matmul
OUT_PAD = _round_up(OUT, LANE)    # 896 = 7*128: lane-dense output stores


def generator_kernel(z_ref, mask_ref, invn_ref,
                     w1_ref, b1_ref,
                     w2_ref, b2_ref, g2_ref, be2_ref,
                     w3_hbm, b3_ref, g3_ref, be3_ref,
                     w4_hbm, b4_ref,
                     out_ref,
                     w3_vmem, w4_vmem, dma_sem):
    # Kick off the two dominant weight DMAs immediately so they stream in while
    # layers 1 and 2 compute.
    cp3 = pltpu.make_async_copy(w3_hbm, w3_vmem, dma_sem.at[0])
    cp4 = pltpu.make_async_copy(w4_hbm, w4_vmem, dma_sem.at[1])
    cp3.start()
    cp4.start()

    x = z_ref[...]                       # (B_pad, Z_PAD) f32, padded rows/cols = 0
    mask = mask_ref[...]                 # (B_pad, 1) f32, 1.0 for valid rows
    inv_n = invn_ref[0]                  # f32 scalar: 1 / (valid batch size)

    def dot(a, w):
        # bf16 x bf16 MXU matmul with f32 accumulation.
        return jnp.dot(a.astype(jnp.bfloat16), w,
                       preferred_element_type=jnp.float32)

    def leaky(v):
        # max(v, 0.2*v) == LeakyReLU(0.2) for slope < 1.
        return jnp.maximum(v, NEG_SLOPE * v)

    def bn(v, g, be):
        # Training-mode BatchNorm1d over the valid rows only (E[x^2] - mean^2;
        # eps = 0.8 keeps this numerically safe).
        vm = v * mask
        s = jnp.sum(vm, axis=0, keepdims=True)
        s2 = jnp.sum(vm * v, axis=0, keepdims=True)
        mean = s * inv_n
        var = s2 * inv_n - mean * mean
        return (v - mean) * lax.rsqrt(var + BN_EPS) * g + be

    # Linear(z_dim -> 128) + LeakyReLU(0.2)
    h = leaky(dot(x, w1_ref[...]) + b1_ref[...])

    # Linear(128 -> 256) + BatchNorm1d(256, eps=0.8) + LeakyReLU(0.2)
    h = leaky(bn(dot(h, w2_ref[...]) + b2_ref[...], g2_ref[...], be2_ref[...]))

    # Linear(256 -> 512) + BatchNorm1d(512, eps=0.8) + LeakyReLU(0.2)
    cp3.wait()
    h = leaky(bn(dot(h, w3_vmem[...]) + b3_ref[...], g3_ref[...], be3_ref[...]))

    # Linear(512 -> 784, zero-padded to 896) + Tanh (padded cols: tanh(0) = 0)
    cp4.wait()
    out_ref[...] = jnp.tanh(dot(h, w4_vmem[...]) + b4_ref[...])


def init_params(key, z_dim=Z_DIM):
    """PyTorch-style init U(-1/sqrt(fan_in), 1/sqrt(fan_in)); weights bf16, padded."""
    ks = jax.random.split(key, 4)

    def linear(k, fan_in, fan_out, pad_in=0, pad_out=0):
        kw, kb = jax.random.split(k)
        bound = 1.0 / float(fan_in) ** 0.5
        w = jax.random.uniform(kw, (fan_in, fan_out), jnp.float32, -bound, bound)
        b = jax.random.uniform(kb, (1, fan_out), jnp.float32, -bound, bound)
        if pad_in or pad_out:
            w = jnp.pad(w, ((0, pad_in), (0, pad_out)))
            b = jnp.pad(b, ((0, 0), (0, pad_out)))
        return w.astype(jnp.bfloat16), b

    w1, b1 = linear(ks[0], z_dim, H1, pad_in=Z_PAD - z_dim)
    w2, b2 = linear(ks[1], H1, H2)
    w3, b3 = linear(ks[2], H2, H3)
    w4, b4 = linear(ks[3], H3, OUT, pad_out=OUT_PAD - OUT)
    g2, be2 = jnp.ones((1, H2), jnp.float32), jnp.zeros((1, H2), jnp.float32)
    g3, be3 = jnp.ones((1, H3), jnp.float32), jnp.zeros((1, H3), jnp.float32)
    return (w1, b1, w2, b2, g2, be2, w3, b3, g3, be3, w4, b4)


def _vmem_capacity_bytes():
    try:
        return int(pltpu.get_tpu_info().vmem_capacity_bytes)
    except Exception:
        return 64 << 20   # conservative: v7x per-core VMEM


def generator_forward(z, params):
    """z: (B, z_dim) float -> (B, 1, 28, 28) float32."""
    B, zd = z.shape
    B_pad = _round_up(max(B, SUBLANE), SUBLANE)

    z_pad = jnp.pad(z.astype(jnp.float32), ((0, B_pad - B), (0, Z_PAD - zd)))
    row_mask = (jnp.arange(B_pad) < B).astype(jnp.float32).reshape(B_pad, 1)
    inv_n = jnp.full((1,), 1.0 / B, dtype=jnp.float32)

    (w1, b1, w2, b2, g2, be2, w3, b3, g3, be3, w4, b4) = params

    vmem = pl.BlockSpec(memory_space=pltpu.MemorySpace.VMEM)
    smem = pl.BlockSpec(memory_space=pltpu.MemorySpace.SMEM)
    anyspace = pl.BlockSpec(memory_space=pl.ANY)

    in_specs = [
        vmem, vmem, smem,            # z, mask, inv_n
        vmem, vmem,                  # w1, b1
        vmem, vmem, vmem, vmem,      # w2, b2, g2, be2
        anyspace, vmem, vmem, vmem,  # w3 (manual DMA), b3, g3, be3
        anyspace, vmem,              # w4 (manual DMA), b4
    ]

    io_bytes = int(z_pad.nbytes) + int(row_mask.nbytes) \
        + sum(int(p.nbytes) for p in params) + B_pad * OUT_PAD * 4
    flops = 2 * B_pad * (Z_PAD * H1 + H1 * H2 + H2 * H3 + H3 * OUT_PAD)
    cost = pl.CostEstimate(flops=flops,
                           transcendentals=B_pad * OUT_PAD,
                           bytes_accessed=io_bytes)

    # Scoped-VMEM budget: activations (double counted for temporaries) + weights
    # (incl. the two manual-DMA scratch buffers) + I/O + headroom.  Cap
    # generation-aware at 3/4 of physical per-core VMEM (~48 MiB on v7x,
    # ~96 MiB on v5e/v6e).
    act_bytes = B_pad * (Z_PAD + H1 + H2 + H3 + 2 * OUT_PAD) * 4
    weight_bytes = sum(int(p.nbytes) for p in params) + (H2 * H3 + H3 * OUT_PAD) * 2
    vmem_needed = (weight_bytes + int(z_pad.nbytes) + int(row_mask.nbytes)
                   + B_pad * OUT_PAD * 4 + 2 * act_bytes + (2 << 20))
    compiler_params = None
    if vmem_needed > (12 << 20):
        cap = (_vmem_capacity_bytes() * 3) // 4
        compiler_params = pltpu.CompilerParams(
            vmem_limit_bytes=int(min(vmem_needed, cap)))

    flat = pl.pallas_call(
        generator_kernel,
        out_shape=jax.ShapeDtypeStruct((B_pad, OUT_PAD), jnp.float32),
        in_specs=in_specs,
        out_specs=vmem,
        scratch_shapes=[
            pltpu.VMEM((H2, H3), jnp.bfloat16),       # w3 staging
            pltpu.VMEM((H3, OUT_PAD), jnp.bfloat16),  # w4 staging
            pltpu.SemaphoreType.DMA((2,)),
        ],
        cost_estimate=cost,
        compiler_params=compiler_params,
    )(z_pad, row_mask, inv_n,
      w1, b1, w2, b2, g2, be2, w3, b3, g3, be3, w4, b4)

    # TODO(synk): downstream consumers that accept the 896-wide layout could skip
    # this slice+reshape pass over HBM entirely.
    return flat[:B, :OUT].reshape(B, 1, 28, 28)


def reference_forward(z, params):
    """Pure-JAX reference mirroring the kernel math (bf16 weights, f32 accum)."""
    (w1, b1, w2, b2, g2, be2, w3, b3, g3, be3, w4, b4) = params

    def dot(a, w):
        return jnp.dot(a.astype(jnp.bfloat16), w, preferred_element_type=jnp.float32)

    def leaky(v):
        return jnp.maximum(v, NEG_SLOPE * v)

    def bn(x, g, be):
        mean = jnp.mean(x, axis=0, keepdims=True)
        var = jnp.mean((x - mean) ** 2, axis=0, keepdims=True)
        return (x - mean) * lax.rsqrt(var + BN_EPS) * g + be

    zp = jnp.pad(z.astype(jnp.float32), ((0, 0), (0, Z_PAD - z.shape[1])))
    h = leaky(dot(zp, w1) + b1)
    h = leaky(bn(dot(h, w2) + b2, g2, be2))
    h = leaky(bn(dot(h, w3) + b3, g3, be3))
    h = jnp.tanh(dot(h, w4) + b4)
    return h[:, :OUT].reshape(-1, 1, 28, 28)


if __name__ == "__main__":
    key = jax.random.PRNGKey(0)
    kz, kp = jax.random.split(key)
    params = init_params(kp)

    # B=32 (multiple of 8, fills sublanes); B=10 exercises the padded-batch
    # masked-BN path.
    for B in (32, 10):
        z = jax.random.normal(jax.random.fold_in(kz, B), (B, Z_DIM), dtype=jnp.float32)
        out = jax.block_until_ready(generator_forward(z, params))
        ref = reference_forward(z, params)
        assert out.shape == (B, 1, 28, 28), out.shape
        assert bool(jnp.all(jnp.isfinite(out)))
        err = float(jnp.max(jnp.abs(out - ref)))
        assert err < 5e-3, err
    print("KERNEL_OK")
</pallas_src>

<mosaic_0001>
module attributes {stable_mosaic.version = 11 : i64} {
  func.func @generator_kernel(%arg0: memref<32x128xf32, #tpu.memory_space<vmem>>, %arg1: memref<32x1xf32, #tpu.memory_space<vmem>>, %arg2: memref<1xf32, #tpu.memory_space<smem>>, %arg3: memref<128x128xbf16, #tpu.memory_space<vmem>>, %arg4: memref<1x128xf32, #tpu.memory_space<vmem>>, %arg5: memref<128x256xbf16, #tpu.memory_space<vmem>>, %arg6: memref<1x256xf32, #tpu.memory_space<vmem>>, %arg7: memref<1x256xf32, #tpu.memory_space<vmem>>, %arg8: memref<1x256xf32, #tpu.memory_space<vmem>>, %arg9: memref<256x512xbf16, #tpu.memory_space<any>>, %arg10: memref<1x512xf32, #tpu.memory_space<vmem>>, %arg11: memref<1x512xf32, #tpu.memory_space<vmem>>, %arg12: memref<1x512xf32, #tpu.memory_space<vmem>>, %arg13: memref<512x896xbf16, #tpu.memory_space<any>>, %arg14: memref<1x896xf32, #tpu.memory_space<vmem>>, %arg15: memref<32x896xf32, #tpu.memory_space<vmem>>, %arg16: memref<256x512xbf16, #tpu.memory_space<vmem>>, %arg17: memref<512x896xbf16, #tpu.memory_space<vmem>>, %arg18: memref<2x!tpu.dma_semaphore, #tpu.memory_space<semaphore_mem>>) attributes {dimension_semantics = [], scalar_prefetch = 0 : i64, scratch_operands = 3 : i64, tpu.core_type = #tpu.core_type<tc>} {
    %c0_i32 = arith.constant 0 : i32
    %0 = tpu.memref_slice %arg18[%c0_i32] : memref<2x!tpu.dma_semaphore, #tpu.memory_space<semaphore_mem>> -> memref<1x!tpu.dma_semaphore, #tpu.memory_space<semaphore_mem>>
    %1 = tpu.memref_squeeze %0 : memref<1x!tpu.dma_semaphore, #tpu.memory_space<semaphore_mem>> -> memref<!tpu.dma_semaphore, #tpu.memory_space<semaphore_mem>>
    tpu.enqueue_dma source(%arg9 : memref<256x512xbf16, #tpu.memory_space<any>>) target(%arg16 : memref<256x512xbf16, #tpu.memory_space<vmem>>) target_semaphore(%1 : memref<!tpu.dma_semaphore, #tpu.memory_space<semaphore_mem>>)
    %c1_i32 = arith.constant 1 : i32
    %2 = tpu.memref_slice %arg18[%c1_i32] : memref<2x!tpu.dma_semaphore, #tpu.memory_space<semaphore_mem>> -> memref<1x!tpu.dma_semaphore, #tpu.memory_space<semaphore_mem>>
    %3 = tpu.memref_squeeze %2 : memref<1x!tpu.dma_semaphore, #tpu.memory_space<semaphore_mem>> -> memref<!tpu.dma_semaphore, #tpu.memory_space<semaphore_mem>>
    tpu.enqueue_dma source(%arg13 : memref<512x896xbf16, #tpu.memory_space<any>>) target(%arg17 : memref<512x896xbf16, #tpu.memory_space<vmem>>) target_semaphore(%3 : memref<!tpu.dma_semaphore, #tpu.memory_space<semaphore_mem>>)
    %c0 = arith.constant 0 : index
    %c0_0 = arith.constant 0 : index
    %4 = vector.load %arg0[%c0, %c0_0] : memref<32x128xf32, #tpu.memory_space<vmem>>, vector<32x128xf32>
    %c0_1 = arith.constant 0 : index
    %c0_2 = arith.constant 0 : index
    %5 = vector.load %arg1[%c0_1, %c0_2] : memref<32x1xf32, #tpu.memory_space<vmem>>, vector<32x1xf32>
    %c0_3 = arith.constant 0 : index
    %6 = memref.load %arg2[%c0_3] : memref<1xf32, #tpu.memory_space<smem>>
    %c0_4 = arith.constant 0 : index
    %c0_5 = arith.constant 0 : index
    %7 = vector.load %arg3[%c0_4, %c0_5] : memref<128x128xbf16, #tpu.memory_space<vmem>>, vector<128x128xbf16>
    %8 = arith.truncf %4 : vector<32x128xf32> to vector<32x128xbf16>
    %cst = arith.constant dense<0.000000e+00> : vector<32x128xf32>
    %9 = tpu.matmul %8, %7, %cst {dimension_numbers = #tpu.dot_dimension_numbers<[1], [0], [0], [1], [0, 0, 1, 1], [], []>} : vector<32x128xbf16>, vector<128x128xbf16>, vector<32x128xf32> -> vector<32x128xf32>
    %c0_6 = arith.constant 0 : index
    %c0_7 = arith.constant 0 : index
    %10 = vector.load %arg4[%c0_6, %c0_7] : memref<1x128xf32, #tpu.memory_space<vmem>>, vector<1x128xf32>
    %11 = vector.broadcast %10 : vector<1x128xf32> to vector<32x128xf32>
    %12 = arith.addf %9, %11 : vector<32x128xf32>
    %cst_8 = arith.constant 2.000000e-01 : f32
    %13 = vector.broadcast %cst_8 : f32 to vector<32x128xf32>
    %14 = arith.mulf %13, %12 : vector<32x128xf32>
    %15 = arith.maximumf %12, %14 : vector<32x128xf32>
    %c0_9 = arith.constant 0 : index
    %c0_10 = arith.constant 0 : index
    %16 = vector.load %arg5[%c0_9, %c0_10] : memref<128x256xbf16, #tpu.memory_space<vmem>>, vector<128x256xbf16>
    %17 = arith.truncf %15 : vector<32x128xf32> to vector<32x128xbf16>
    %cst_11 = arith.constant dense<0.000000e+00> : vector<32x256xf32>
    %18 = tpu.matmul %17, %16, %cst_11 {dimension_numbers = #tpu.dot_dimension_numbers<[1], [0], [0], [1], [0, 0, 1, 1], [], []>} : vector<32x128xbf16>, vector<128x256xbf16>, vector<32x256xf32> -> vector<32x256xf32>
    %c0_12 = arith.constant 0 : index
    %c0_13 = arith.constant 0 : index
    %19 = vector.load %arg6[%c0_12, %c0_13] : memref<1x256xf32, #tpu.memory_space<vmem>>, vector<1x256xf32>
    %20 = vector.broadcast %19 : vector<1x256xf32> to vector<32x256xf32>
    %21 = arith.addf %18, %20 : vector<32x256xf32>
    %c0_14 = arith.constant 0 : index
    %c0_15 = arith.constant 0 : index
    %22 = vector.load %arg7[%c0_14, %c0_15] : memref<1x256xf32, #tpu.memory_space<vmem>>, vector<1x256xf32>
    %c0_16 = arith.constant 0 : index
    %c0_17 = arith.constant 0 : index
    %23 = vector.load %arg8[%c0_16, %c0_17] : memref<1x256xf32, #tpu.memory_space<vmem>>, vector<1x256xf32>
    %24 = vector.broadcast %5 : vector<32x1xf32> to vector<32x256xf32>
    %25 = arith.mulf %21, %24 : vector<32x256xf32>
    %cst_18 = arith.constant dense<0.000000e+00> : vector<256xf32>
    %26 = vector.multi_reduction <add>, %25, %cst_18 [0] : vector<32x256xf32> to vector<256xf32>
    %27 = vector.shape_cast %26 : vector<256xf32> to vector<1x256xf32>
    %28 = arith.mulf %25, %21 : vector<32x256xf32>
    %cst_19 = arith.constant dense<0.000000e+00> : vector<256xf32>
    %29 = vector.multi_reduction <add>, %28, %cst_19 [0] : vector<32x256xf32> to vector<256xf32>
    %30 = vector.shape_cast %29 : vector<256xf32> to vector<1x256xf32>
    %31 = vector.broadcast %6 : f32 to vector<1x256xf32>
    %32 = arith.mulf %27, %31 : vector<1x256xf32>
    %33 = vector.broadcast %6 : f32 to vector<1x256xf32>
    %34 = arith.mulf %30, %33 : vector<1x256xf32>
    %35 = arith.mulf %32, %32 : vector<1x256xf32>
    %36 = arith.subf %34, %35 : vector<1x256xf32>
    %37 = vector.broadcast %32 : vector<1x256xf32> to vector<32x256xf32>
    %38 = arith.subf %21, %37 : vector<32x256xf32>
    %cst_20 = arith.constant 8.000000e-01 : f32
    %39 = vector.broadcast %cst_20 : f32 to vector<1x256xf32>
    %40 = arith.addf %36, %39 : vector<1x256xf32>
    %41 = math.rsqrt %40 : vector<1x256xf32>
    %42 = vector.broadcast %41 : vector<1x256xf32> to vector<32x256xf32>
    %43 = arith.mulf %38, %42 : vector<32x256xf32>
    %44 = vector.broadcast %22 : vector<1x256xf32> to vector<32x256xf32>
    %45 = arith.mulf %43, %44 : vector<32x256xf32>
    %46 = vector.broadcast %23 : vector<1x256xf32> to vector<32x256xf32>
    %47 = arith.addf %45, %46 : vector<32x256xf32>
    %cst_21 = arith.constant 2.000000e-01 : f32
    %48 = vector.broadcast %cst_21 : f32 to vector<32x256xf32>
    %49 = arith.mulf %48, %47 : vector<32x256xf32>
    %50 = arith.maximumf %47, %49 : vector<32x256xf32>
    %c0_i32_22 = arith.constant 0 : i32
    %51 = tpu.memref_slice %arg18[%c0_i32_22] : memref<2x!tpu.dma_semaphore, #tpu.memory_space<semaphore_mem>> -> memref<1x!tpu.dma_semaphore, #tpu.memory_space<semaphore_mem>>
    %52 = tpu.memref_squeeze %51 : memref<1x!tpu.dma_semaphore, #tpu.memory_space<semaphore_mem>> -> memref<!tpu.dma_semaphore, #tpu.memory_space<semaphore_mem>>
    tpu.wait_dma2 semaphore(%52 : memref<!tpu.dma_semaphore, #tpu.memory_space<semaphore_mem>>) src(%arg9 : memref<256x512xbf16, #tpu.memory_space<any>>) dst(%arg16 : memref<256x512xbf16, #tpu.memory_space<vmem>>)
    %c0_23 = arith.constant 0 : index
    %c0_24 = arith.constant 0 : index
    %53 = vector.load %arg16[%c0_23, %c0_24] : memref<256x512xbf16, #tpu.memory_space<vmem>>, vector<256x512xbf16>
    %54 = arith.truncf %50 : vector<32x256xf32> to vector<32x256xbf16>
    %cst_25 = arith.constant dense<0.000000e+00> : vector<32x512xf32>
    %55 = tpu.matmul %54, %53, %cst_25 {dimension_numbers = #tpu.dot_dimension_numbers<[1], [0], [0], [1], [0, 0, 1, 1], [], []>} : vector<32x256xbf16>, vector<256x512xbf16>, vector<32x512xf32> -> vector<32x512xf32>
    %c0_26 = arith.constant 0 : index
    %c0_27 = arith.constant 0 : index
    %56 = vector.load %arg10[%c0_26, %c0_27] : memref<1x512xf32, #tpu.memory_space<vmem>>, vector<1x512xf32>
    %57 = vector.broadcast %56 : vector<1x512xf32> to vector<32x512xf32>
    %58 = arith.addf %55, %57 : vector<32x512xf32>
    %c0_28 = arith.constant 0 : index
    %c0_29 = arith.constant 0 : index
    %59 = vector.load %arg11[%c0_28, %c0_29] : memref<1x512xf32, #tpu.memory_space<vmem>>, vector<1x512xf32>
    %c0_30 = arith.constant 0 : index
    %c0_31 = arith.constant 0 : index
    %60 = vector.load %arg12[%c0_30, %c0_31] : memref<1x512xf32, #tpu.memory_space<vmem>>, vector<1x512xf32>
    %61 = vector.broadcast %5 : vector<32x1xf32> to vector<32x512xf32>
    %62 = arith.mulf %58, %61 : vector<32x512xf32>
    %cst_32 = arith.constant dense<0.000000e+00> : vector<512xf32>
    %63 = vector.multi_reduction <add>, %62, %cst_32 [0] : vector<32x512xf32> to vector<512xf32>
    %64 = vector.shape_cast %63 : vector<512xf32> to vector<1x512xf32>
    %65 = arith.mulf %62, %58 : vector<32x512xf32>
    %cst_33 = arith.constant dense<0.000000e+00> : vector<512xf32>
    %66 = vector.multi_reduction <add>, %65, %cst_33 [0] : vector<32x512xf32> to vector<512xf32>
    %67 = vector.shape_cast %66 : vector<512xf32> to vector<1x512xf32>
    %68 = vector.broadcast %6 : f32 to vector<1x512xf32>
    %69 = arith.mulf %64, %68 : vector<1x512xf32>
    %70 = vector.broadcast %6 : f32 to vector<1x512xf32>
    %71 = arith.mulf %67, %70 : vector<1x512xf32>
    %72 = arith.mulf %69, %69 : vector<1x512xf32>
    %73 = arith.subf %71, %72 : vector<1x512xf32>
    %74 = vector.broadcast %69 : vector<1x512xf32> to vector<32x512xf32>
    %75 = arith.subf %58, %74 : vector<32x512xf32>
    %cst_34 = arith.constant 8.000000e-01 : f32
    %76 = vector.broadcast %cst_34 : f32 to vector<1x512xf32>
    %77 = arith.addf %73, %76 : vector<1x512xf32>
    %78 = math.rsqrt %77 : vector<1x512xf32>
    %79 = vector.broadcast %78 : vector<1x512xf32> to vector<32x512xf32>
    %80 = arith.mulf %75, %79 : vector<32x512xf32>
    %81 = vector.broadcast %59 : vector<1x512xf32> to vector<32x512xf32>
    %82 = arith.mulf %80, %81 : vector<32x512xf32>
    %83 = vector.broadcast %60 : vector<1x512xf32> to vector<32x512xf32>
    %84 = arith.addf %82, %83 : vector<32x512xf32>
    %cst_35 = arith.constant 2.000000e-01 : f32
    %85 = vector.broadcast %cst_35 : f32 to vector<32x512xf32>
    %86 = arith.mulf %85, %84 : vector<32x512xf32>
    %87 = arith.maximumf %84, %86 : vector<32x512xf32>
    %c1_i32_36 = arith.constant 1 : i32
    %88 = tpu.memref_slice %arg18[%c1_i32_36] : memref<2x!tpu.dma_semaphore, #tpu.memory_space<semaphore_mem>> -> memref<1x!tpu.dma_semaphore, #tpu.memory_space<semaphore_mem>>
    %89 = tpu.memref_squeeze %88 : memref<1x!tpu.dma_semaphore, #tpu.memory_space<semaphore_mem>> -> memref<!tpu.dma_semaphore, #tpu.memory_space<semaphore_mem>>
    tpu.wait_dma2 semaphore(%89 : memref<!tpu.dma_semaphore, #tpu.memory_space<semaphore_mem>>) src(%arg13 : memref<512x896xbf16, #tpu.memory_space<any>>) dst(%arg17 : memref<512x896xbf16, #tpu.memory_space<vmem>>)
    %c0_37 = arith.constant 0 : index
    %c0_38 = arith.constant 0 : index
    %90 = vector.load %arg17[%c0_37, %c0_38] : memref<512x896xbf16, #tpu.memory_space<vmem>>, vector<512x896xbf16>
    %91 = arith.truncf %87 : vector<32x512xf32> to vector<32x512xbf16>
    %cst_39 = arith.constant dense<0.000000e+00> : vector<32x896xf32>
    %92 = tpu.matmul %91, %90, %cst_39 {dimension_numbers = #tpu.dot_dimension_numbers<[1], [0], [0], [1], [0, 0, 1, 1], [], []>} : vector<32x512xbf16>, vector<512x896xbf16>, vector<32x896xf32> -> vector<32x896xf32>
    %c0_40 = arith.constant 0 : index
    %c0_41 = arith.constant 0 : index
    %93 = vector.load %arg14[%c0_40, %c0_41] : memref<1x896xf32, #tpu.memory_space<vmem>>, vector<1x896xf32>
    %94 = vector.broadcast %93 : vector<1x896xf32> to vector<32x896xf32>
    %95 = arith.addf %92, %94 : vector<32x896xf32>
    %96 = math.tanh %95 : vector<32x896xf32>
    %c0_42 = arith.constant 0 : index
    %c0_43 = arith.constant 0 : index
    %97 = vector.load %arg15[%c0_42, %c0_43] : memref<32x896xf32, #tpu.memory_space<vmem>>, vector<32x896xf32>
    tpu.vector_store %arg15[%c0_42, %c0_43], %96 {strides = array<i32>} : memref<32x896xf32, #tpu.memory_space<vmem>>, vector<32x896xf32>,
    return
  }
}

</mosaic_0001>

<bundles_post_ra>
// kernel: tpu_custom_call.1
= control target key start
LH: loop header
LB: loop body
LE: loop exit
PB: predicated region body
PF: predicated region fallthrough
CT: control target
= control target key end

     0   :  { %21 = vsyncpa [#allocation7], 0  ;;  %s5140_s0 = inlined_call_operand.vmem [shape: f32[32,128], index: 0, kind: input, shape index: {}]   ;;  %s5141_s1 = inlined_call_operand.vmem [shape: f32[32,1], index: 1, kind: input, shape index: {}]   ;;  %s5142_s2 = inlined_call_operand.<no memory space> [shape: f32[1], index: 2, kind: input, shape index: {}]   ;;  %s5143_s3 = inlined_call_operand.hbm [shape: bf16[128,128], index: 3, kind: input, shape index: {}]   ;;  %s5144_s4 = inlined_call_operand.hbm [shape: f32[1,128], index: 4, kind: input, shape index: {}]   ;;  %s5145_s5 = inlined_call_operand.hbm [shape: bf16[128,256], index: 5, kind: input, shape index: {}]   ;;  %s5146_s6 = inlined_call_operand.hbm [shape: f32[1,256], index: 6, kind: input, shape index: {}]   ;;  %s5147_s7 = inlined_call_operand.hbm [shape: f32[1,256], index: 7, kind: input, shape index: {}]   ;;  %s5148_s8 = inlined_call_operand.hbm [shape: f32[1,256], index: 8, kind: input, shape index: {}]   ;;  %s5149_s9 = inlined_call_operand.hbm [shape: bf16[256,512], index: 9, kind: input, shape index: {}]   ;;  %s5150_s10 = inlined_call_operand.vmem [shape: f32[1,512], index: 10, kind: input, shape index: {}]   ;;  %s5151_s11 = inlined_call_operand.vmem [shape: f32[1,512], index: 11, kind: input, shape index: {}]   ;;  %s5152_s12 = inlined_call_operand.vmem [shape: f32[1,512], index: 12, kind: input, shape index: {}]   ;;  %s5153_s13 = inlined_call_operand.hbm [shape: bf16[512,896], index: 13, kind: input, shape index: {}]   ;;  %s5154_s14 = inlined_call_operand.vmem [shape: f32[1,896], index: 14, kind: input, shape index: {}]   ;;  %s5155_s15 = inlined_call_operand.hbm [shape: f32[32,896], index: 15, kind: output, shape index: {}]  }
   0x1   :  { %22 = vsyncpa [#allocation10], 0 }
   0x2   :  { %23 = vsyncpa [#allocation13], 0 }
   0x3   :  { %24 = vsyncpa [#allocation16], 0 }
   0x4   :  { %25 = vsyncpa [#allocation8], 0  ;;  %s4484_s18 = smov [#allocation9]   ;;  %s4485_s20 = smov [#allocation12]  }
   0x5   :  { %s50_s19 = sshll.u32 %s4484_s18, 4  ;;  %s72_s21 = sshll.u32 %s4485_s20, 4  ;;  %s51_s19 = int_to_ptr.vmem [resolvable:$true] %s50_s19  ;;  %s73_s21 = int_to_ptr.vmem [resolvable:$true] %s72_s21 }
   0x6   :  { %s4298_s22 = scalar_lea.vmem %s51_s19, 16  ;;  %s4302_s23 = scalar_lea.vmem %s51_s19, 32 }
   0x7   :  { %p4299_p0 = scmp.ne.s32.totalorder %s51_s19, %s4298_s22  ;;  %p4303_p1 = scmp.lt.s32.totalorder %s51_s19, %s51_s19 }
   0x8   :  { %p4304_p2 = scmp.lt.s32.totalorder %s4302_s23, %s4298_s22 }
   0xa   :  { %p4305_p3 = por %p4304_p2, %p4303_p1 }
   0xc   :  { %p4306_p4 = pnand %p4305_p3, %p4299_p0 }
   0xe   :  { %4309 = shalt.err (!%p4306_p4)
}
   0xf   :  { %53 = dma.hbm_to_vmem [thread:$0]  %s5144_s4, 16, %s51_s19, [#allocation10]  }
  0x10   :  { %s4318_s26 = scalar_lea.vmem %s73_s21, 32  ;;  %p4323_p6 = scmp.lt.s32.totalorder %s73_s21, %s73_s21 }
  0x11   :  { %p4319_p5 = scmp.ne.s32.totalorder %s73_s21, %s4318_s26  ;;  %p4324_p7 = scmp.lt.s32.totalorder %s4318_s26, %s4318_s26 }
  0x13   :  { %p4325_p8 = por %p4324_p7, %p4323_p6 }
  0x15   :  { %p4326_p9 = pnand %p4325_p8, %p4319_p5 }
  0x17   :  { %4329 = shalt.err (!%p4326_p9)
}
  0x18   :  { %75 = dma.hbm_to_vmem [thread:$0]  %s5146_s6, 32, %s73_s21, [#allocation13]  }
  0x19   :  { %s4486_s29 = smov [#allocation6]  }
  0x1a   :  { %s37_s30 = sshll.u32 %s4486_s29, 4  ;;  %s38_s30 = int_to_ptr.vmem [resolvable:$true] %s37_s30 }
  0x1b   :  { %s4338_s16 = scalar_lea.vmem %s38_s30, 1024  ;;  %p4343_p11 = scmp.lt.s32.totalorder %s38_s30, %s38_s30 }
  0x1c   :  { %p4339_p10 = scmp.ne.s32.totalorder %s38_s30, %s4338_s16  ;;  %p4344_p12 = scmp.lt.s32.totalorder %s4338_s16, %s4338_s16 }
  0x1e   :  { %p4345_p13 = por %p4344_p12, %p4343_p11 }
  0x20   :  { %p4346_p0 = pnand %p4345_p13, %p4339_p10 }
  0x22   :  { %4349 = shalt.err (!%p4346_p0)
}
  0x23   :  { %s4487_s4 = smov 64   ;;  %s4488_s17 = smov 4  }
  0x24   :  { %43 = dma.hbm_to_vmem [thread:$0]  %s5143_s3, 1024, %s38_s30, [#allocation7], %s4487_s4, %s4487_s4, %s4488_s17  }
  0x25   :  { %s4489_s20 = smov [#allocation11]  }
  0x26   :  { %s59_s22 = sshll.u32 %s4489_s20, 4  ;;  %s60_s22 = int_to_ptr.vmem [resolvable:$true] %s59_s22 }
  0x27   :  { %s4358_s6 = scalar_lea.vmem %s60_s22, 2048  ;;  %p4363_p2 = scmp.lt.s32.totalorder %s60_s22, %s60_s22 }
  0x28   :  { %p4359_p1 = scmp.ne.s32.totalorder %s60_s22, %s4358_s6  ;;  %p4364_p3 = scmp.lt.s32.totalorder %s4358_s6, %s4358_s6 }
  0x2a   :  { %p4365_p4 = por %p4364_p3, %p4363_p2 }
  0x2c   :  { %p4366_p5 = pnand %p4365_p4, %p4359_p1 }
  0x2e   :  { %4369 = shalt.err (!%p4366_p5)
}
  0x2f   :  { %s4490_s21 = smov 128   ;;  %s4491_s23 = smov 8  }
  0x30   :  { %65 = dma.hbm_to_vmem [thread:$0]  %s5145_s5, 2048, %s60_s22, [#allocation10], %s4490_s21, %s4490_s21, %s4491_s23  }
  0x31   :  { %s4492_s26 = smov [#allocation14]   ;;  %s4493_s28 = smov [#allocation15]  }
  0x32   :  { %s82_s27 = sshll.u32 %s4492_s26, 4  ;;  %s92_s3 = sshll.u32 %s4493_s28, 4  ;;  %s83_s27 = int_to_ptr.vmem [resolvable:$true] %s82_s27  ;;  %s93_s3 = int_to_ptr.vmem [resolvable:$true] %s92_s3 }
  0x33   :  { %s4378_s29 = scalar_lea.vmem %s83_s27, 32  ;;  %p4383_p7 = scmp.lt.s32.totalorder %s83_s27, %s83_s27 }
  0x34   :  { %p4379_p6 = scmp.ne.s32.totalorder %s83_s27, %s4378_s29  ;;  %p4384_p8 = scmp.lt.s32.totalorder %s4378_s29, %s4378_s29 }
  0x36   :  { %p4385_p9 = por %p4384_p8, %p4383_p7 }
  0x38   :  { %p4386_p10 = pnand %p4385_p9, %p4379_p6 }
  0x3a   :  { %4389 = shalt.err (!%p4386_p10)
}
  0x3b   :  { %85 = dma.hbm_to_vmem [thread:$0]  %s5147_s7, 32, %s83_s27, [#allocation13]  }
  0x3c   :  { %s4398_s4 = scalar_lea.vmem %s93_s3, 32  ;;  %p4403_p12 = scmp.lt.s32.totalorder %s93_s3, %s93_s3 }
  0x3d   :  { %p4399_p11 = scmp.ne.s32.totalorder %s93_s3, %s4398_s4  ;;  %p4404_p13 = scmp.lt.s32.totalorder %s4398_s4, %s4398_s4 }
  0x3f   :  { %p4405_p0 = por %p4404_p13, %p4403_p12 }
  0x41   :  { %p4406_p1 = pnand %p4405_p0, %p4399_p11 }
  0x43   :  { %4409 = shalt.err (!%p4406_p1)
}
  0x44   :  { %95 = dma.hbm_to_vmem [thread:$0]  %s5148_s8, 32, %s93_s3, [#allocation16]  }
  0x45   :  { %4470 = dma.done.wait [#allocation7], 1024  }
  0x46   :  { %4471 = vsyncadd [#allocation7], 4294966272 }
  0x47   :  { %4472 = dma.done.wait [#allocation10], 2064  }
  0x48   :  { %4473 = vsyncadd [#allocation10], 4294965232 }
  0x49   :  { %4474 = dma.done.wait [#allocation13], 64  }
  0x4a   :  { %4475 = vsyncadd [#allocation13], 4294967232 }
  0x4b   :  { %4476 = dma.done.wait [#allocation16], 32  }
  0x4c   :  { %4477 = vsyncadd [#allocation16], 4294967264  ;;  %v3774_v0 = vld [vmem:[#allocation6 + $0x38] sm:$0xff]   ;;  %v3775_v1 = vld [vmem:[#allocation6 + $0x30] sm:$0xff]   ;;  %v4494_v30 = vmov 0   ;;  %s4496_s30 = smov [#allocation3]  }
  0x4d   :  { %3736 = vmatprep.subr.bf16.mxu0 %v3774_v0  ;;  %v3776_v2 = vld [vmem:[#allocation6 + $0x28] sm:$0xff]   ;;  %v3777_v3 = vld [vmem:[#allocation6 + $0x20] sm:$0xff]   ;;  %v3784_v8 = vld [vmem:[#allocation11 + $0x70] ss:$8 sps:$4 sm:$0xff]   ;;  %427 = vmatprep.mubr.bf16.mxu1 %v4494_v30  ;;  %s142_s16 = sshll.u32 %s4496_s30, 4  ;;  %s143_s16 = int_to_ptr.vmem [resolvable:$true] %s142_s16 }
  0x4e   :  { %3737 = vmatpush3.bf16.msra.mxu0 %v3774_v0  ;;  %v146_v4 = vld [vmem:[%s5140_s0] sm:$0xff]  ;;  %v147_v5 = vld [vmem:[%s5140_s0 + $0x8] sm:$0xff]  ;;  %v3778_v10 = vld [vmem:[#allocation6 + $0x18] sm:$0xff]   ;;  %3772 = vset.pattern.permute.xlu0 %v4494_v30 }
  0x4f   :  { %3738 = vmatprep.subr.bf16.mxu0 %v3775_v1  ;;  %v171_v6 = vpack.c.bf16 %v147_v5, %v146_v4  ;;  %v3782_v7 = vld [vmem:[#allocation11 + $0x74] ss:$8 sps:$4 sm:$0xff]   ;;  %v3785_v9 = vld [vmem:[#allocation11 + $0x64] ss:$8 sps:$4 sm:$0xff]   ;;  %v3787_v11 = vld [vmem:[#allocation11 + $0x60] ss:$8 sps:$4 sm:$0xff]   ;;  %3773 = vset.pattern.permute.xlu1 %v4494_v30 }
  0x50   :  { %395 = vmatprep.subr.bf16.mxu1 %v3782_v7  ;;  %v3788_v12 = vld [vmem:[#allocation11 + $0x54] ss:$8 sps:$4 sm:$0xff]   ;;  %v3790_v14 = vld [vmem:[#allocation11 + $0x50] ss:$8 sps:$4 sm:$0xff]   ;;  %v3791_v15 = vld [vmem:[#allocation11 + $0x44] ss:$8 sps:$4 sm:$0xff]  }
  0x51   :  { %3752 = vmatprep.mubr.bf16.mxu0 %v171_v6  ;;  %396 = vmatpush1.bf16.msra.mxu1 %v3784_v8  ;;  %v3779_v13 = vld [vmem:[#allocation6 + $0x10] sm:$0xff]   ;;  %v3780_v16 = vld [vmem:[#allocation6 + $0x8] sm:$0xff]   ;;  %v3781_v19 = vld [vmem:[#allocation6] sm:$0xff]  }
  0x52   :  { %3739 = vmatpush3.bf16.msra.mxu0 %v3775_v1  ;;  %397 = vmatprep.subr.bf16.mxu1 %v3785_v9  ;;  %v3793_v17 = vld [vmem:[#allocation11 + $0x40] ss:$8 sps:$4 sm:$0xff]   ;;  %v3794_v18 = vld [vmem:[#allocation11 + $0x34] ss:$8 sps:$4 sm:$0xff]   ;;  %v3796_v23 = vld [vmem:[#allocation11 + $0x30] ss:$8 sps:$4 sm:$0xff]  }
  0x53   :  { %3740 = vmatprep.subr.bf16.mxu0 %v3776_v2  ;;  %v148_v20 = vld [vmem:[%s5140_s0 + $0x10] sm:$0xff]  ;;  %v149_v21 = vld [vmem:[%s5140_s0 + $0x18] sm:$0xff]  ;;  %v3799_v25 = vld [vmem:[#allocation11 + $0x20] ss:$8 sps:$4 sm:$0xff]  }
  0x54   :  { %v172_v22 = vpack.c.bf16 %v149_v21, %v148_v20  ;;  %v3797_v24 = vld [vmem:[#allocation11 + $0x24] ss:$8 sps:$4 sm:$0xff]   ;;  %v3800_v26 = vld [vmem:[#allocation11 + $0x14] ss:$8 sps:$4 sm:$0xff]   ;;  %v3802_v27 = vld [vmem:[#allocation11 + $0x10] ss:$8 sps:$4 sm:$0xff]  }
  0x55   :  { %398 = vmatpush1.bf16.msra.mxu1 %v3787_v11  ;;  %v3803_v28 = vld [vmem:[#allocation11 + $0x4] ss:$8 sps:$4 sm:$0xff]   ;;  %v3805_v29 = vld [vmem:[#allocation11] ss:$8 sps:$4 sm:$0xff]   ;;  %v153_v34 = vld [vmem:[%s5141_s1 + $0x18] sm:$0xff] }
  0x56   :  { %3741 = vmatpush3.bf16.msra.mxu0 %v3776_v2  ;;  %399 = vmatprep.subr.bf16.mxu1 %v3788_v12  ;;  %v150_v31 = vld [vmem:[%s5141_s1] sm:$0xff]  ;;  %v152_v32 = vld [vmem:[%s5141_s1 + $0x10] sm:$0xff]  ;;  %v151_v33 = vld [vmem:[%s5141_s1 + $0x8] sm:$0xff]  ;;  %s4495_s1 = smov [#allocation2]  }
  0x57   :  { %3742 = vmatprep.subr.bf16.mxu0 %v3777_v3  ;;  %452 = vperm.xlu0 %3772, %v150_v31   ;;  %v3355_v36 = vld [vmem:[#allocation9] ss:$0 sm:$0xff]  ;;  %s130_s29 = sshll.u32 %s4495_s1, 4  ;;  %s131_s29 = int_to_ptr.vmem [resolvable:$true] %s130_s29 }
  0x58   :  { %462 = vperm.xlu1 %3773, %v152_v32   ;;  %s4418_s4 = scalar_lea.vmem %s131_s29, 8192  ;;  %p4423_p3 = scmp.lt.s32.totalorder %s131_s29, %s131_s29 }
  0x59   :  { %400 = vmatpush1.bf16.msra.mxu1 %v3790_v14  ;;  %p4419_p2 = scmp.ne.s32.totalorder %s131_s29, %s4418_s4  ;;  %p4424_p4 = scmp.lt.s32.totalorder %s4418_s4, %s4418_s4 }
  0x5a   :  { %3743 = vmatpush3.bf16.msra.mxu0 %v3777_v3  ;;  %401 = vmatprep.subr.bf16.mxu1 %v3791_v15 }
  0x5b   :  { %3744 = vmatprep.subr.bf16.mxu0 %v3778_v10  ;;  %457 = vperm.xlu0 %3772, %v151_v33   ;;  %p4425_p5 = por %p4424_p4, %p4423_p3 }
  0x5c   :  { %467 = vperm.xlu1 %3773, %v153_v34  }
  0x5d   :  { %402 = vmatpush1.bf16.msra.mxu1 %v3793_v17  ;;  %p4426_p6 = pnand %p4425_p5, %p4419_p2 }
  0x5e   :  { %3745 = vmatpush3.bf16.msra.mxu0 %v3778_v10  ;;  %403 = vmatprep.subr.bf16.mxu1 %v3794_v18 }
  0x5f   :  { %3746 = vmatprep.subr.bf16.mxu0 %v3779_v13 }
  0x61   :  { %404 = vmatpush1.bf16.msra.mxu1 %v3796_v23 }
  0x62   :  { %3747 = vmatpush3.bf16.msra.mxu0 %v3779_v13  ;;  %405 = vmatprep.subr.bf16.mxu1 %v3797_v24 }
  0x63   :  { %3748 = vmatprep.subr.bf16.mxu0 %v3780_v16 }
  0x65   :  { %406 = vmatpush1.bf16.msra.mxu1 %v3799_v25 }
  0x66   :  { %3749 = vmatpush3.bf16.msra.mxu0 %v3780_v16  ;;  %407 = vmatprep.subr.bf16.mxu1 %v3800_v26 }
  0x67   :  { %3750 = vmatprep.subr.bf16.mxu0 %v3781_v19 }
  0x69   :  { %408 = vmatpush1.bf16.msra.mxu1 %v3802_v27 }
  0x6a   :  { %3751 = vmatpush3.bf16.msra.mxu0 %v3781_v19  ;;  %409 = vmatprep.subr.bf16.mxu1 %v3803_v28 }
  0x6d   :  { %3753 = vmatmul.mubr.bf16.vlgmr.msra.gmra.mxu0 %v172_v22  ;;  %410 = vmatpush1.bf16.msra.mxu1 %v3805_v29 }
 0x12d   :  { %v3754_v35 = vpop.f32.mrf.mxu0 }
 0x12e   :  { %v271_v45 = vadd.f32 %v3754_v35, %v3355_v36 }
 0x12f   :  { %v262_v37 = vpop.f32.mrf.mxu0 }
 0x130   :  { %v263_v38 = vadd.f32 %v3355_v36, %v262_v37  ;;  %v279_v50 = vmul.f32 0.2, %v271_v45 }
 0x131   :  { %v3755_v39 = vpop.f32.mrf.mxu0 }
 0x132   :  { %v277_v41 = vmul.f32 0.2, %v263_v38  ;;  %v274_v43 = vadd.f32 %v3755_v39, %v3355_v36  ;;  %v283_v52 = vmax.f32 %v271_v45, %v279_v50 }
 0x133   :  { %v265_v40 = vpop.f32.mrf.mxu0 }
 0x134   :  { %v266_v42 = vadd.f32 %v3355_v36, %v265_v40  ;;  %v281_v46 = vmax.f32 %v263_v38, %v277_v41  ;;  %v280_v48 = vmul.f32 0.2, %v274_v43 }
 0x136   :  { %v278_v44 = vmul.f32 0.2, %v266_v42  ;;  %v284_v51 = vmax.f32 %v274_v43, %v280_v48 }
 0x138   :  { %v282_v47 = vmax.f32 %v266_v42, %v278_v44  ;;  %v302_v53 = vpack.c.bf16 %v284_v51, %v283_v52 }
 0x13a   :  { %v301_v49 = vpack.c.bf16 %v282_v47, %v281_v46 }
 0x13c   :  { %428 = vmatmul.mubr.bf16.vlgmr.msra.gmra.mxu1 %v301_v49 }
 0x13d   :  { %437 = vmatprep.mubr.bf16.mxu1 %v4494_v30 }
 0x144   :  { %438 = vmatmul.mubr.bf16.gmra.mxu1 %v302_v53 }
 0x145   :  { %4429 = shalt.err (!%p4426_p6)  }
 0x146   :  { %133 = dma.hbm_to_vmem [thread:$0]  %s5149_s9, 8192, %s131_s29, [#allocation4] }
 0x147   :  { %s4438_s7 = scalar_lea.vmem %s143_s16, 28672  ;;  %p4443_p8 = scmp.lt.s32.totalorder %s143_s16, %s143_s16 }
 0x148   :  { %p4439_p7 = scmp.ne.s32.totalorder %s143_s16, %s4438_s7  ;;  %p4444_p9 = scmp.lt.s32.totalorder %s4438_s7, %s4438_s7 }
 0x14a   :  { %p4445_p10 = por %p4444_p9, %p4443_p8 }
 0x14c   :  { %p4446_p11 = pnand %p4445_p10, %p4439_p7 }
 0x14e   :  { %4449 = shalt.err (!%p4446_p11)  }
 0x14f   :  { %145 = dma.hbm_to_vmem [thread:$0]  %s5153_s13, 28672, %s143_s16, [#allocation4 + $0x1]  ;;  %v305_v54 = vlaneseq  ;;  %v303_v57 = vld [vmem:[#allocation12] sm:$0x3]  ;;  %v4633_v58 = vpop.permute.xlu0 %452  ;;  %v4654_v9 = vpop.permute.xlu1 %462 }
 0x151   :  { %v4628_v55 = vshrl.u32 %v305_v54, 7 }
 0x153   :  { %v4631_v56 = vsub.s32 0, %v4628_v55  ;;  %v4636_v59 = vsub.s32 1, %v4628_v55  ;;  %v4642_v2 = vpop.permute.xlu0 %457  ;;  %v4675_v27 = vpop.permute.xlu1 %467 }
 0x155   :  { %v308_v60 = vrot.slane %v303_v57, %v4631_v56  ;;  %v312_v62 = vrot.slane %v303_v57, %v4636_v59 }
 0x1fc   :  { %v429_v61 = vpop.f32.mrf.mxu1 }
 0x1fd   :  { %v4640_v0 = vadd.f32 %v429_v61, %v308_v60 }
 0x1fe   :  { %v431_v63 = vpop.f32.mrf.mxu1 }
 0x1ff   :  { %v4646_v4 = vadd.f32 %v431_v63, %v312_v62  ;;  %v470_v8 = vmul.f32 %v4633_v58, %v4640_v0 }
 0x200   :  { %v433_v1 = vpop.f32.mrf.mxu1 }
 0x201   :  { %v4644_v3 = vadd.f32 %v433_v1, %v308_v60  ;;  %v471_v13 = vmul.f32 %v4633_v58, %v4646_v4  ;;  %v496_v17 = vmul.f32 %v470_v8, %v4640_v0 }
 0x202   :  { %v435_v5 = vpop.f32.mrf.mxu1 }
 0x203   :  { %v472_v6 = vmul.f32 %v4642_v2, %v4644_v3  ;;  %v4650_v7 = vadd.f32 %v435_v5, %v312_v62  ;;  %v497_v24 = vmul.f32 %v471_v13, %v4646_v4  ;;  %v4689_v5 = vstv %s5142_s2 }
 0x204   :  { %v439_v10 = vpop.f32.mrf.mxu1 }
 0x205   :  { %v473_v11 = vmul.f32 %v4642_v2, %v4650_v7  ;;  %v4658_v12 = vadd.f32 %v439_v10, %v308_v60  ;;  %v498_v14 = vmul.f32 %v472_v6, %v4644_v3  ;;  %v478_v21 = vadd.f32 %v472_v6, %v470_v8 }
 0x206   :  { %v441_v15 = vpop.f32.mrf.mxu1 }
 0x207   :  { %v474_v16 = vmul.f32 %v4654_v9, %v4658_v12  ;;  %v499_v18 = vmul.f32 %v473_v11, %v4650_v7  ;;  %v4667_v19 = vadd.f32 %v441_v15, %v312_v62  ;;  %v504_v25 = vadd.f32 %v498_v14, %v496_v17 }
 0x208   :  { %v443_v20 = vpop.f32.mrf.mxu1  ;;  %v487_v29 = vadd.f32 %v473_v11, %v471_v13 }
 0x209   :  { %v500_v22 = vmul.f32 %v474_v16, %v4658_v12  ;;  %v4670_v23 = vadd.f32 %v443_v20, %v308_v60  ;;  %v475_v26 = vmul.f32 %v4654_v9, %v4667_v19  ;;  %v479_v30 = vadd.f32 %v478_v21, %v474_v16 }
 0x20a   :  { %v445_v28 = vpop.f32.mrf.mxu1  ;;  %v513_v33 = vadd.f32 %v499_v18, %v497_v24 }
 0x20b   :  { %v476_v31 = vmul.f32 %v4675_v27, %v4670_v23  ;;  %v4679_v32 = vadd.f32 %v445_v28, %v312_v62  ;;  %v505_v34 = vadd.f32 %v504_v25, %v500_v22  ;;  %v501_v35 = vmul.f32 %v475_v26, %v4667_v19 }
 0x20c   :  { %v488_v36 = vadd.f32 %v487_v29, %v475_v26 }
 0x20d   :  { %v480_v37 = vadd.f32 %v479_v30, %v476_v31  ;;  %v502_v38 = vmul.f32 %v476_v31, %v4670_v23  ;;  %v477_v39 = vmul.f32 %v4675_v27, %v4679_v32  ;;  %v514_v40 = vadd.f32 %v513_v33, %v501_v35  ;;  %v448_v30 = vld [vmem:[#allocation14] sm:$0x3]  ;;  %v449_v31 = vld [vmem:[#allocation15] sm:$0x3] }
 0x20e   :  { %v555_v33 = vrot.slane %v448_v30, %v4631_v56 }
 0x20f   :  { %v481_v41 = vrot.slane %v480_v37, 4  ;;  %v506_v42 = vadd.f32 %v505_v34, %v502_v38  ;;  %v489_v43 = vadd.f32 %v488_v36, %v477_v39  ;;  %v503_v44 = vmul.f32 %v477_v39, %v4679_v32 }
 0x210   :  { %v574_v39 = vrot.slane %v449_v31, %v4631_v56 }
 0x211   :  { %v482_v45 = vadd.f32 %v481_v41, %v480_v37  ;;  %v507_v46 = vrot.slane %v506_v42, 4  ;;  %v490_v47 = vrot.slane %v489_v43, 4  ;;  %v515_v48 = vadd.f32 %v514_v40, %v503_v44 }
 0x212   :  { %v578_v40 = vrot.slane %v449_v31, %v4636_v59  ;;  %v559_v41 = vrot.slane %v448_v30, %v4636_v59 }
 0x213   :  { %v483_v49 = vrot.slane %v482_v45, 2  ;;  %v508_v50 = vadd.f32 %v507_v46, %v506_v42  ;;  %v491_v51 = vadd.f32 %v490_v47, %v489_v43  ;;  %v516_v52 = vrot.slane %v515_v48, 4 }
 0x215   :  { %v484_v53 = vadd.f32 %v483_v49, %v482_v45  ;;  %v509_v54 = vrot.slane %v508_v50, 2  ;;  %v492_v57 = vrot.slane %v491_v51, 2  ;;  %v517_v60 = vadd.f32 %v516_v52, %v515_v48 }
 0x217   :  { %v485_v61 = vrot.slane %v484_v53, 1  ;;  %v510_v62 = vadd.f32 %v509_v54, %v508_v50  ;;  %v493_v63 = vadd.f32 %v492_v57, %v491_v51  ;;  %v518_v1 = vrot.slane %v517_v60, 2 }
 0x219   :  { %v486_v6 = vadd.f32 %v485_v61, %v484_v53  ;;  %v511_v8 = vrot.slane %v510_v62, 1  ;;  %v494_v10 = vrot.slane %v493_v63, 1  ;;  %v519_v11 = vadd.f32 %v518_v1, %v517_v60 }
 0x21b   :  { %v512_v13 = vadd.f32 %v511_v8, %v510_v62  ;;  %v523_v14 = vmul.f32 %v4689_v5, %v486_v6  ;;  %v495_v15 = vadd.f32 %v494_v10, %v493_v63  ;;  %v520_v16 = vrot.slane %v519_v11, 1 }
 0x21d   :  { %v525_v17 = vmul.f32 %v4689_v5, %v512_v13  ;;  %v527_v18 = vmul.f32 %v523_v14, %v523_v14  ;;  %v521_v20 = vadd.f32 %v520_v16, %v519_v11  ;;  %v524_v21 = vmul.f32 %v4689_v5, %v495_v15 }
 0x21e   :  { %v531_v34 = vsub.f32 %v4640_v0, %v523_v14  ;;  %v533_v35 = vsub.f32 %v4644_v3, %v523_v14  ;;  %v535_v36 = vsub.f32 %v4658_v12, %v523_v14  ;;  %v537_v37 = vsub.f32 %v4670_v23, %v523_v14 }
 0x21f   :  { %v529_v22 = vsub.f32 %v525_v17, %v527_v18  ;;  %v526_v24 = vmul.f32 %v4689_v5, %v521_v20  ;;  %v528_v25 = vmul.f32 %v524_v21, %v524_v21  ;;  %v532_v46 = vsub.f32 %v4646_v4, %v524_v21 }
 0x220   :  { %v534_v0 = vsub.f32 %v4650_v7, %v524_v21  ;;  %v536_v3 = vsub.f32 %v4667_v19, %v524_v21  ;;  %v538_v12 = vsub.f32 %v4679_v32, %v524_v21 }
 0x221   :  { %v539_v26 = vadd.f32 0.8, %v529_v22  ;;  %v530_v28 = vsub.f32 %v526_v24, %v528_v25 }
 0x223   :  { %3806 = vrsqrt.f32 %v539_v26  ;;  %v540_v29 = vadd.f32 0.8, %v530_v28 }
 0x225   :  { %3808 = vrsqrt.f32 %v540_v29 }
 0x230   :  { %v3807_v38 = vpop.eup %3806 }
 0x231   :  { %v543_v42 = vmul.f32 %v3807_v38, %v531_v34  ;;  %v545_v43 = vmul.f32 %v3807_v38, %v533_v35  ;;  %v547_v44 = vmul.f32 %v3807_v38, %v535_v36  ;;  %v549_v45 = vmul.f32 %v3807_v38, %v537_v37 }
 0x232   :  { %v3809_v23 = vpop.eup %3808 }
 0x233   :  { %v562_v47 = vmul.f32 %v555_v33, %v543_v42  ;;  %v564_v48 = vmul.f32 %v555_v33, %v545_v43  ;;  %v566_v49 = vmul.f32 %v555_v33, %v547_v44  ;;  %v568_v50 = vmul.f32 %v555_v33, %v549_v45 }
 0x234   :  { %v544_v51 = vmul.f32 %v3809_v23, %v532_v46  ;;  %v546_v52 = vmul.f32 %v3809_v23, %v534_v0  ;;  %v548_v53 = vmul.f32 %v3809_v23, %v536_v3  ;;  %v550_v54 = vmul.f32 %v3809_v23, %v538_v12 }
 0x235   :  { %v4707_v57 = vadd.f32 %v574_v39, %v562_v47  ;;  %v4709_v60 = vadd.f32 %v574_v39, %v564_v48  ;;  %v4711_v4 = vadd.f32 %v574_v39, %v566_v49  ;;  %v4713_v7 = vadd.f32 %v574_v39, %v568_v50 }
 0x236   :  { %v563_v19 = vmul.f32 %v559_v41, %v544_v51  ;;  %v565_v61 = vmul.f32 %v559_v41, %v546_v52  ;;  %v567_v32 = vmul.f32 %v559_v41, %v548_v53  ;;  %v569_v62 = vmul.f32 %v559_v41, %v550_v54 }
 0x237   :  { %v4716_v63 = vmul.f32 0.2, %v4707_v57  ;;  %v4719_v1 = vmul.f32 0.2, %v4709_v60  ;;  %v4722_v6 = vmul.f32 0.2, %v4711_v4 }
 0x238   :  { %v4725_v8 = vmul.f32 0.2, %v4713_v7  ;;  %v582_v10 = vadd.f32 %v578_v40, %v563_v19  ;;  %v584_v11 = vadd.f32 %v578_v40, %v565_v61  ;;  %v4727_v13 = vadd.f32 %v578_v40, %v567_v32 }
 0x239   :  { %v597_v14 = vmax.f32 %v4707_v57, %v4716_v63  ;;  %v599_v15 = vmax.f32 %v4709_v60, %v4719_v1  ;;  %v601_v16 = vmax.f32 %v4711_v4, %v4722_v6  ;;  %v4735_v17 = vadd.f32 %v578_v40, %v569_v62 }
 0x23a   :  { %v603_v18 = vmax.f32 %v4713_v7, %v4725_v8  ;;  %v590_v20 = vmul.f32 0.2, %v582_v10  ;;  %v592_v21 = vmul.f32 0.2, %v584_v11  ;;  %v4740_v22 = vmul.f32 0.2, %v4727_v13 }
 0x23b   :  { %v4743_v24 = vmul.f32 0.2, %v4735_v17 }
 0x23c   :  { %v598_v25 = vmax.f32 %v582_v10, %v590_v20  ;;  %v600_v26 = vmax.f32 %v584_v11, %v592_v21  ;;  %v602_v28 = vmax.f32 %v4727_v13, %v4740_v22 }
 0x23d   :  { %v604_v29 = vmax.f32 %v4735_v17, %v4743_v24 }
 0x23e   :  { %4478 = dma.done.wait [#allocation4], 8192 }
 0x23f   :  { %4479 = vsyncadd [#allocation4], 4294959104  ;;  %v674_v30 = vpack.c.bf16 %v600_v26, %v598_v25  ;;  %v3810_v31 = vld [vmem:[#allocation2 + $0xe4] ss:$16 sps:$4 sm:$0xff]   ;;  %v3812_v33 = vld [vmem:[#allocation2 + $0xec] ss:$16 sps:$4 sm:$0xff]   ;;  %v675_v57 = vpack.c.bf16 %v603_v18, %v601_v16 }
 0x240   :  { %1019 = vmatprep.subr.bf16.mxu0 %v3810_v31  ;;  %v3814_v34 = vld [vmem:[#allocation2 + $0xe0] ss:$16 sps:$4 sm:$0xff]   ;;  %v3815_v35 = vld [vmem:[#allocation2 + $0xe8] ss:$16 sps:$4 sm:$0xff]   ;;  %1072 = vmatprep.subr.bf16.mxu1 %v3812_v33  ;;  %v3816_v36 = vld [vmem:[#allocation2 + $0xc4] ss:$16 sps:$4 sm:$0xff]  }
 0x241   :  { %1051 = vmatprep.mubr.bf16.mxu0 %v674_v30  ;;  %1104 = vmatprep.mubr.bf16.mxu1 %v674_v30  ;;  %v3818_v37 = vld [vmem:[#allocation2 + $0xcc] ss:$16 sps:$4 sm:$0xff]   ;;  %v3820_v38 = vld [vmem:[#allocation2 + $0xc0] ss:$16 sps:$4 sm:$0xff]   ;;  %v3821_v39 = vld [vmem:[#allocation2 + $0xc8] ss:$16 sps:$4 sm:$0xff]  }
 0x242   :  { %1020 = vmatpush1.bf16.msra.mxu0 %v3814_v34  ;;  %1073 = vmatpush1.bf16.msra.mxu1 %v3815_v35  ;;  %v3822_v40 = vld [vmem:[#allocation2 + $0xa4] ss:$16 sps:$4 sm:$0xff]   ;;  %v3824_v41 = vld [vmem:[#allocation2 + $0xac] ss:$16 sps:$4 sm:$0xff]   ;;  %v3826_v42 = vld [vmem:[#allocation2 + $0xa0] ss:$16 sps:$4 sm:$0xff]  }
 0x243   :  { %1021 = vmatprep.subr.bf16.mxu0 %v3816_v36  ;;  %1074 = vmatprep.subr.bf16.mxu1 %v3818_v37  ;;  %v3827_v43 = vld [vmem:[#allocation2 + $0xa8] ss:$16 sps:$4 sm:$0xff]   ;;  %v3828_v44 = vld [vmem:[#allocation2 + $0x84] ss:$16 sps:$4 sm:$0xff]   ;;  %v3830_v45 = vld [vmem:[#allocation2 + $0x8c] ss:$16 sps:$4 sm:$0xff]  }
 0x244   :  { %v3832_v46 = vld [vmem:[#allocation2 + $0x80] ss:$16 sps:$4 sm:$0xff]   ;;  %v3833_v0 = vld [vmem:[#allocation2 + $0x88] ss:$16 sps:$4 sm:$0xff]   ;;  %v3834_v3 = vld [vmem:[#allocation2 + $0x64] ss:$16 sps:$4 sm:$0xff]  }
 0x245   :  { %v3836_v12 = vld [vmem:[#allocation2 + $0x6c] ss:$16 sps:$4 sm:$0xff]   ;;  %v3838_v23 = vld [vmem:[#allocation2 + $0x60] ss:$16 sps:$4 sm:$0xff]   ;;  %v3839_v47 = vld [vmem:[#allocation2 + $0x68] ss:$16 sps:$4 sm:$0xff]  }
 0x246   :  { %1022 = vmatpush1.bf16.msra.mxu0 %v3820_v38  ;;  %1075 = vmatpush1.bf16.msra.mxu1 %v3821_v39  ;;  %v3840_v48 = vld [vmem:[#allocation2 + $0x44] ss:$16 sps:$4 sm:$0xff]   ;;  %v3842_v49 = vld [vmem:[#allocation2 + $0x4c] ss:$16 sps:$4 sm:$0xff]   ;;  %v3844_v50 = vld [vmem:[#allocation2 + $0x40] ss:$16 sps:$4 sm:$0xff]  }
 0x247   :  { %1023 = vmatprep.subr.bf16.mxu0 %v3822_v40  ;;  %1076 = vmatprep.subr.bf16.mxu1 %v3824_v41  ;;  %v3845_v51 = vld [vmem:[#allocation2 + $0x48] ss:$16 sps:$4 sm:$0xff]   ;;  %v3846_v52 = vld [vmem:[#allocation2 + $0x24] ss:$16 sps:$4 sm:$0xff]   ;;  %v3848_v53 = vld [vmem:[#allocation2 + $0x2c] ss:$16 sps:$4 sm:$0xff]  }
 0x248   :  { %v3850_v54 = vld [vmem:[#allocation2 + $0x20] ss:$16 sps:$4 sm:$0xff]   ;;  %v3851_v19 = vld [vmem:[#allocation2 + $0x28] ss:$16 sps:$4 sm:$0xff]   ;;  %v3852_v61 = vld [vmem:[#allocation2 + $0x4] ss:$16 sps:$4 sm:$0xff]  }
 0x249   :  { %v3854_v32 = vld [vmem:[#allocation2 + $0xc] ss:$16 sps:$4 sm:$0xff]   ;;  %v3856_v62 = vld [vmem:[#allocation2] ss:$16 sps:$4 sm:$0xff]   ;;  %v3857_v10 = vld [vmem:[#allocation2 + $0x8] ss:$16 sps:$4 sm:$0xff]  }
 0x24a   :  { %1024 = vmatpush1.bf16.msra.mxu0 %v3826_v42  ;;  %1077 = vmatpush1.bf16.msra.mxu1 %v3827_v43  ;;  %v3858_v11 = vld [vmem:[#allocation2 + $0x1e4] ss:$16 sps:$4 sm:$0xff]   ;;  %v3860_v20 = vld [vmem:[#allocation2 + $0x1ec] ss:$16 sps:$4 sm:$0xff]   ;;  %v3862_v21 = vld [vmem:[#allocation2 + $0x1e0] ss:$16 sps:$4 sm:$0xff]  }
 0x24b   :  { %1025 = vmatprep.subr.bf16.mxu0 %v3828_v44  ;;  %1078 = vmatprep.subr.bf16.mxu1 %v3830_v45  ;;  %v3863_v25 = vld [vmem:[#allocation2 + $0x1e8] ss:$16 sps:$4 sm:$0xff]   ;;  %v3864_v26 = vld [vmem:[#allocation2 + $0x1c4] ss:$16 sps:$4 sm:$0xff]   ;;  %v3866_v30 = vld [vmem:[#allocation2 + $0x1cc] ss:$16 sps:$4 sm:$0xff]  }
 0x24c   :  { %v3868_v31 = vld [vmem:[#allocation2 + $0x1c0] ss:$16 sps:$4 sm:$0xff]   ;;  %v3869_v33 = vld [vmem:[#allocation2 + $0x1c8] ss:$16 sps:$4 sm:$0xff]   ;;  %v3870_v34 = vld [vmem:[#allocation2 + $0x1a4] ss:$16 sps:$4 sm:$0xff]  }
 0x24d   :  { %v3872_v35 = vld [vmem:[#allocation2 + $0x1ac] ss:$16 sps:$4 sm:$0xff]   ;;  %v3874_v36 = vld [vmem:[#allocation2 + $0x1a0] ss:$16 sps:$4 sm:$0xff]   ;;  %v3875_v37 = vld [vmem:[#allocation2 + $0x1a8] ss:$16 sps:$4 sm:$0xff]  }
 0x24e   :  { %1026 = vmatpush1.bf16.msra.mxu0 %v3832_v46  ;;  %1079 = vmatpush1.bf16.msra.mxu1 %v3833_v0  ;;  %v3876_v38 = vld [vmem:[#allocation2 + $0x184] ss:$16 sps:$4 sm:$0xff]   ;;  %v3878_v39 = vld [vmem:[#allocation2 + $0x18c] ss:$16 sps:$4 sm:$0xff]   ;;  %v3880_v40 = vld [vmem:[#allocation2 + $0x180] ss:$16 sps:$4 sm:$0xff]  }
 0x24f   :  { %1027 = vmatprep.subr.bf16.mxu0 %v3834_v3  ;;  %1080 = vmatprep.subr.bf16.mxu1 %v3836_v12  ;;  %v3881_v41 = vld [vmem:[#allocation2 + $0x188] ss:$16 sps:$4 sm:$0xff]   ;;  %v3882_v42 = vld [vmem:[#allocation2 + $0x164] ss:$16 sps:$4 sm:$0xff]   ;;  %v3884_v43 = vld [vmem:[#allocation2 + $0x16c] ss:$16 sps:$4 sm:$0xff]  }
 0x250   :  { %v3886_v44 = vld [vmem:[#allocation2 + $0x160] ss:$16 sps:$4 sm:$0xff]   ;;  %v3887_v45 = vld [vmem:[#allocation2 + $0x168] ss:$16 sps:$4 sm:$0xff]   ;;  %v3888_v46 = vld [vmem:[#allocation2 + $0x144] ss:$16 sps:$4 sm:$0xff]  }
 0x251   :  { %v3890_v0 = vld [vmem:[#allocation2 + $0x14c] ss:$16 sps:$4 sm:$0xff]   ;;  %v3892_v3 = vld [vmem:[#allocation2 + $0x140] ss:$16 sps:$4 sm:$0xff]   ;;  %v3893_v12 = vld [vmem:[#allocation2 + $0x148] ss:$16 sps:$4 sm:$0xff]  }
 0x252   :  { %1028 = vmatpush1.bf16.msra.mxu0 %v3838_v23  ;;  %1081 = vmatpush1.bf16.msra.mxu1 %v3839_v47  ;;  %v3894_v23 = vld [vmem:[#allocation2 + $0x124] ss:$16 sps:$4 sm:$0xff]   ;;  %v3896_v47 = vld [vmem:[#allocation2 + $0x12c] ss:$16 sps:$4 sm:$0xff]   ;;  %v4768_v60 = vsub.s32 2, %v4628_v55  ;;  %v4774_v1 = vsub.s32 3, %v4628_v55 }
 0x253   :  { %1029 = vmatprep.subr.bf16.mxu0 %v3840_v48  ;;  %1082 = vmatprep.subr.bf16.mxu1 %v3842_v49  ;;  %v3898_v48 = vld [vmem:[#allocation2 + $0x120] ss:$16 sps:$4 sm:$0xff]   ;;  %v3899_v49 = vld [vmem:[#allocation2 + $0x128] ss:$16 sps:$4 sm:$0xff]  }
 0x254   :  { %v677_v63 = vld [vmem:[%s5150_s10] sm:$0xf] }
 0x255   :  { %v682_v13 = vrot.slane %v677_v63, %v4631_v56  ;;  %v690_v4 = vrot.slane %v677_v63, %v4768_v60  ;;  %v4779_v6 = vrot.slane %v677_v63, %v4636_v59  ;;  %v4782_v7 = vrot.slane %v677_v63, %v4774_v1 }
 0x256   :  { %1030 = vmatpush1.bf16.msra.mxu0 %v3844_v50  ;;  %1083 = vmatpush1.bf16.msra.mxu1 %v3845_v51  ;;  %v3900_v50 = vld [vmem:[#allocation2 + $0x104] ss:$16 sps:$4 sm:$0xff]   ;;  %v3902_v51 = vld [vmem:[#allocation2 + $0x10c] ss:$16 sps:$4 sm:$0xff]  }
 0x257   :  { %1031 = vmatprep.subr.bf16.mxu0 %v3846_v52  ;;  %1084 = vmatprep.subr.bf16.mxu1 %v3848_v53  ;;  %v3904_v52 = vld [vmem:[#allocation2 + $0x100] ss:$16 sps:$4 sm:$0xff]   ;;  %v3905_v53 = vld [vmem:[#allocation2 + $0x108] ss:$16 sps:$4 sm:$0xff]  }
 0x25a   :  { %1032 = vmatpush1.bf16.msra.mxu0 %v3850_v54  ;;  %1085 = vmatpush1.bf16.msra.mxu1 %v3851_v19  ;;  %v673_v54 = vpack.c.bf16 %v599_v15, %v597_v14  ;;  %v676_v19 = vpack.c.bf16 %v604_v29, %v602_v28 }
 0x25b   :  { %1033 = vmatprep.subr.bf16.mxu0 %v3852_v61  ;;  %1086 = vmatprep.subr.bf16.mxu1 %v3854_v32 }
 0x25e   :  { %1034 = vmatpush1.bf16.msra.mxu0 %v3856_v62  ;;  %1087 = vmatpush1.bf16.msra.mxu1 %v3857_v10 }
 0x25f   :  { %1035 = vmatprep.subr.bf16.mxu0 %v3858_v11  ;;  %1088 = vmatprep.subr.bf16.mxu1 %v3860_v20 }
 0x262   :  { %1036 = vmatpush2.bf16.msra.mxu0 %v3862_v21  ;;  %1089 = vmatpush2.bf16.msra.mxu1 %v3863_v25 }
 0x263   :  { %1037 = vmatprep.subr.bf16.mxu0 %v3864_v26  ;;  %1090 = vmatprep.subr.bf16.mxu1 %v3866_v30 }
 0x266   :  { %1038 = vmatpush2.bf16.msra.mxu0 %v3868_v31  ;;  %1091 = vmatpush2.bf16.msra.mxu1 %v3869_v33 }
 0x267   :  { %1039 = vmatprep.subr.bf16.mxu0 %v3870_v34  ;;  %1092 = vmatprep.subr.bf16.mxu1 %v3872_v35 }
 0x26a   :  { %1040 = vmatpush2.bf16.msra.mxu0 %v3874_v36  ;;  %1093 = vmatpush2.bf16.msra.mxu1 %v3875_v37 }
 0x26b   :  { %1041 = vmatprep.subr.bf16.mxu0 %v3876_v38  ;;  %1094 = vmatprep.subr.bf16.mxu1 %v3878_v39 }
 0x26e   :  { %1042 = vmatpush2.bf16.msra.mxu0 %v3880_v40  ;;  %1095 = vmatpush2.bf16.msra.mxu1 %v3881_v41 }
 0x26f   :  { %1043 = vmatprep.subr.bf16.mxu0 %v3882_v42  ;;  %1096 = vmatprep.subr.bf16.mxu1 %v3884_v43 }
 0x272   :  { %1044 = vmatpush2.bf16.msra.mxu0 %v3886_v44  ;;  %1097 = vmatpush2.bf16.msra.mxu1 %v3887_v45 }
 0x273   :  { %1045 = vmatprep.subr.bf16.mxu0 %v3888_v46  ;;  %1098 = vmatprep.subr.bf16.mxu1 %v3890_v0 }
 0x276   :  { %1046 = vmatpush2.bf16.msra.mxu0 %v3892_v3  ;;  %1099 = vmatpush2.bf16.msra.mxu1 %v3893_v12 }
 0x277   :  { %1047 = vmatprep.subr.bf16.mxu0 %v3894_v23  ;;  %1100 = vmatprep.subr.bf16.mxu1 %v3896_v47 }
 0x27a   :  { %1048 = vmatpush2.bf16.msra.mxu0 %v3898_v48  ;;  %1101 = vmatpush2.bf16.msra.mxu1 %v3899_v49 }
 0x27b   :  { %1049 = vmatprep.subr.bf16.mxu0 %v3900_v50  ;;  %1102 = vmatprep.subr.bf16.mxu1 %v3902_v51 }
 0x27e   :  { %1050 = vmatpush2.bf16.msra.mxu0 %v3904_v52  ;;  %1103 = vmatpush2.bf16.msra.mxu1 %v3905_v53 }
 0x281   :  { %1052 = vmatmul.mubr.bf16.vlgmr.msra.gmra.mxu0 %v673_v54  ;;  %1105 = vmatmul.mubr.bf16.vlgmr.msra.gmra.mxu1 %v673_v54 }
 0x282   :  { %1061 = vmatprep.mubr.bf16.mxu0 %v676_v19  ;;  %1114 = vmatprep.mubr.bf16.mxu1 %v676_v19 }
 0x289   :  { %1062 = vmatmul.mubr.bf16.gmra.mxu0 %v675_v57  ;;  %1115 = vmatmul.mubr.bf16.gmra.mxu1 %v675_v57 }
 0x341   :  { %v1053_v8 = vpop.f32.mrf.mxu0  ;;  %v1106_v14 = vpop.f32.mrf.mxu1 }
 0x342   :  { %v4784_v15 = vadd.f32 %v1053_v8, %v682_v13  ;;  %v4786_v16 = vadd.f32 %v1106_v14, %v690_v4 }
 0x343   :  { %v1055_v17 = vpop.f32.mrf.mxu0  ;;  %v1108_v18 = vpop.f32.mrf.mxu1 }
 0x344   :  { %v4789_v22 = vadd.f32 %v1055_v17, %v4779_v6  ;;  %v4792_v24 = vadd.f32 %v1108_v18, %v4782_v7  ;;  %v1127_v28 = vmul.f32 %v4784_v15, %v4633_v58  ;;  %v1129_v29 = vmul.f32 %v4786_v16, %v4633_v58 }
 0x345   :  { %v1057_v61 = vpop.f32.mrf.mxu0  ;;  %v1110_v32 = vpop.f32.mrf.mxu1 }
 0x346   :  { %v1128_v62 = vmul.f32 %v4789_v22, %v4633_v58  ;;  %v1130_v10 = vmul.f32 %v4792_v24, %v4633_v58  ;;  %v4802_v11 = vadd.f32 %v1057_v61, %v682_v13  ;;  %v4804_v20 = vadd.f32 %v1110_v32, %v690_v4 }
 0x347   :  { %v1059_v21 = vpop.f32.mrf.mxu0  ;;  %v1112_v25 = vpop.f32.mrf.mxu1  ;;  %v1179_v31 = vmul.f32 %v1127_v28, %v4784_v15  ;;  %v1181_v33 = vmul.f32 %v1129_v29, %v4786_v16 }
 0x348   :  { %v4807_v26 = vadd.f32 %v1059_v21, %v4779_v6  ;;  %v4810_v30 = vadd.f32 %v1112_v25, %v4782_v7  ;;  %v1131_v34 = vmul.f32 %v4802_v11, %v4642_v2  ;;  %v1133_v58 = vmul.f32 %v4804_v20, %v4642_v2 }
 0x349   :  { %v1063_v35 = vpop.f32.mrf.mxu0  ;;  %v1116_v36 = vpop.f32.mrf.mxu1  ;;  %v1180_v41 = vmul.f32 %v1128_v62, %v4789_v22  ;;  %v1182_v42 = vmul.f32 %v1130_v10, %v4792_v24 }
 0x34a   :  { %v1132_v37 = vmul.f32 %v4807_v26, %v4642_v2  ;;  %v1134_v38 = vmul.f32 %v4810_v30, %v4642_v2  ;;  %v4822_v39 = vadd.f32 %v1063_v35, %v682_v13  ;;  %v4824_v40 = vadd.f32 %v1116_v36, %v690_v4 }
 0x34b   :  { %v1183_v43 = vmul.f32 %v1131_v34, %v4802_v11  ;;  %v1185_v44 = vmul.f32 %v1133_v58, %v4804_v20  ;;  %v1065_v45 = vpop.f32.mrf.mxu0  ;;  %v1118_v46 = vpop.f32.mrf.mxu1  ;;  %v1143_v0 = vadd.f32 %v1131_v34, %v1127_v28  ;;  %v1161_v3 = vadd.f32 %v1133_v58, %v1129_v29 }
 0x34c   :  { %v1184_v12 = vmul.f32 %v1132_v37, %v4807_v26  ;;  %v1186_v2 = vmul.f32 %v1134_v38, %v4810_v30  ;;  %v1152_v23 = vadd.f32 %v1132_v37, %v1128_v62  ;;  %v1170_v47 = vadd.f32 %v1134_v38, %v1130_v10 }
 0x34d   :  { %v1135_v48 = vmul.f32 %v4822_v39, %v4654_v9  ;;  %v1137_v49 = vmul.f32 %v4824_v40, %v4654_v9  ;;  %v1067_v50 = vpop.f32.mrf.mxu0  ;;  %v1120_v51 = vpop.f32.mrf.mxu1  ;;  %v1195_v52 = vadd.f32 %v1183_v43, %v1179_v31  ;;  %v1213_v53 = vadd.f32 %v1185_v44, %v1181_v33 }
 0x34e   :  { %v4837_v54 = vadd.f32 %v1065_v45, %v4779_v6  ;;  %v4840_v19 = vadd.f32 %v1118_v46, %v4782_v7  ;;  %v1204_v57 = vadd.f32 %v1184_v12, %v1180_v41  ;;  %v1222_v63 = vadd.f32 %v1186_v2, %v1182_v42 }
 0x34f   :  { %v1187_v8 = vmul.f32 %v1135_v48, %v4822_v39  ;;  %v1189_v14 = vmul.f32 %v1137_v49, %v4824_v40  ;;  %v1069_v17 = vpop.f32.mrf.mxu0  ;;  %v1122_v18 = vpop.f32.mrf.mxu1  ;;  %v4848_v61 = vadd.f32 %v1067_v50, %v682_v13  ;;  %v4850_v32 = vadd.f32 %v1120_v51, %v690_v4 }
 0x350   :  { %v1136_v28 = vmul.f32 %v4837_v54, %v4654_v9  ;;  %v1138_v29 = vmul.f32 %v4840_v19, %v4654_v9  ;;  %v1144_v62 = vadd.f32 %v1143_v0, %v1135_v48  ;;  %v1162_v10 = vadd.f32 %v1161_v3, %v1137_v49 }
 0x351   :  { %v4853_v21 = vadd.f32 %v1069_v17, %v4779_v6  ;;  %v4856_v25 = vadd.f32 %v1122_v18, %v4782_v7  ;;  %v1196_v31 = vadd.f32 %v1195_v52, %v1187_v8  ;;  %v1214_v33 = vadd.f32 %v1213_v53, %v1189_v14 }
 0x352   :  { %v1188_v34 = vmul.f32 %v1136_v28, %v4837_v54  ;;  %v1190_v58 = vmul.f32 %v1138_v29, %v4840_v19  ;;  %v1139_v9 = vmul.f32 %v4848_v61, %v4675_v27  ;;  %v1141_v13 = vmul.f32 %v4850_v32, %v4675_v27 }
 0x353   :  { %v1140_v4 = vmul.f32 %v4853_v21, %v4675_v27  ;;  %v1142_v6 = vmul.f32 %v4856_v25, %v4675_v27  ;;  %v1153_v7 = vadd.f32 %v1152_v23, %v1136_v28  ;;  %v1171_v36 = vadd.f32 %v1170_v47, %v1138_v29 }
 0x354   :  { %v1205_v35 = vadd.f32 %v1204_v57, %v1188_v34  ;;  %v1223_v37 = vadd.f32 %v1222_v63, %v1190_v58  ;;  %v1145_v38 = vadd.f32 %v1144_v62, %v1139_v9  ;;  %v1191_v41 = vmul.f32 %v1139_v9, %v4848_v61 }
 0x355   :  { %v1163_v42 = vadd.f32 %v1162_v10, %v1141_v13  ;;  %v1193_v43 = vmul.f32 %v1141_v13, %v4850_v32  ;;  %v1154_v44 = vadd.f32 %v1153_v7, %v1140_v4  ;;  %v1192_v45 = vmul.f32 %v1140_v4, %v4853_v21 }
 0x356   :  { %v1172_v46 = vadd.f32 %v1171_v36, %v1142_v6  ;;  %v1194_v0 = vmul.f32 %v1142_v6, %v4856_v25  ;;  %v1146_v3 = vrot.slane %v1145_v38, 4  ;;  %v1197_v12 = vadd.f32 %v1196_v31, %v1191_v41 }
 0x357   :  { %v1164_v2 = vrot.slane %v1163_v42, 4  ;;  %v1215_v27 = vadd.f32 %v1214_v33, %v1193_v43  ;;  %v1155_v23 = vrot.slane %v1154_v44, 4  ;;  %v1206_v48 = vadd.f32 %v1205_v35, %v1192_v45 }
 0x358   :  { %v1173_v47 = vrot.slane %v1172_v46, 4  ;;  %v1224_v49 = vadd.f32 %v1223_v37, %v1194_v0  ;;  %v1147_v50 = vadd.f32 %v1146_v3, %v1145_v38  ;;  %v1198_v51 = vrot.slane %v1197_v12, 4 }
 0x359   :  { %v1165_v52 = vadd.f32 %v1164_v2, %v1163_v42  ;;  %v1216_v53 = vrot.slane %v1215_v27, 4  ;;  %v1156_v57 = vadd.f32 %v1155_v23, %v1154_v44  ;;  %v1207_v63 = vrot.slane %v1206_v48, 4 }
 0x35a   :  { %v1174_v8 = vadd.f32 %v1173_v47, %v1172_v46  ;;  %v1225_v14 = vrot.slane %v1224_v49, 4  ;;  %v1148_v17 = vrot.slane %v1147_v50, 2  ;;  %v1199_v18 = vadd.f32 %v1198_v51, %v1197_v12 }
 0x35b   :  { %v1166_v28 = vrot.slane %v1165_v52, 2  ;;  %v1217_v29 = vadd.f32 %v1216_v53, %v1215_v27  ;;  %v1157_v62 = vrot.slane %v1156_v57, 2  ;;  %v1208_v10 = vadd.f32 %v1207_v63, %v1206_v48 }
 0x35c   :  { %v1175_v31 = vrot.slane %v1174_v8, 2  ;;  %v1226_v33 = vadd.f32 %v1225_v14, %v1224_v49  ;;  %v1149_v34 = vadd.f32 %v1148_v17, %v1147_v50  ;;  %v1200_v58 = vrot.slane %v1199_v18, 2 }
 0x35d   :  { %v1167_v9 = vadd.f32 %v1166_v28, %v1165_v52  ;;  %v1218_v13 = vrot.slane %v1217_v29, 2  ;;  %v1158_v4 = vadd.f32 %v1157_v62, %v1156_v57  ;;  %v1209_v6 = vrot.slane %v1208_v10, 2 }
 0x35e   :  { %v1176_v7 = vadd.f32 %v1175_v31, %v1174_v8  ;;  %v1227_v35 = vrot.slane %v1226_v33, 2  ;;  %v1150_v36 = vrot.slane %v1149_v34, 1  ;;  %v1201_v37 = vadd.f32 %v1200_v58, %v1199_v18 }
 0x35f   :  { %v1168_v38 = vrot.slane %v1167_v9, 1  ;;  %v1219_v41 = vadd.f32 %v1218_v13, %v1217_v29  ;;  %v1159_v42 = vrot.slane %v1158_v4, 1  ;;  %v1210_v43 = vadd.f32 %v1209_v6, %v1208_v10  ;;  %v1126_v6 = vld [vmem:[%s5152_s12] sm:$0xf] }
 0x360   :  { %v1177_v44 = vrot.slane %v1176_v7, 1  ;;  %v1228_v45 = vadd.f32 %v1227_v35, %v1226_v33  ;;  %v1151_v46 = vadd.f32 %v1150_v36, %v1149_v34  ;;  %v1202_v0 = vrot.slane %v1201_v37, 1 }
 0x361   :  { %v1169_v3 = vadd.f32 %v1168_v38, %v1167_v9  ;;  %v1220_v12 = vrot.slane %v1219_v41, 1  ;;  %v1160_v2 = vadd.f32 %v1159_v42, %v1158_v4  ;;  %v1211_v27 = vrot.slane %v1210_v43, 1 }
 0x362   :  { %v1178_v23 = vadd.f32 %v1177_v44, %v1176_v7  ;;  %v1229_v48 = vrot.slane %v1228_v45, 1  ;;  %v1203_v47 = vadd.f32 %v1202_v0, %v1201_v37  ;;  %v1231_v49 = vmul.f32 %v1151_v46, %v4689_v5  ;;  %v1125_v7 = vld [vmem:[%s5151_s11] sm:$0xf] }
 0x363   :  { %v1221_v50 = vadd.f32 %v1220_v12, %v1219_v41  ;;  %v1233_v51 = vmul.f32 %v1169_v3, %v4689_v5  ;;  %v1212_v52 = vadd.f32 %v1211_v27, %v1210_v43  ;;  %v4875_v53 = vmul.f32 %v1160_v2, %v4689_v5 }
 0x364   :  { %v1235_v57 = vmul.f32 %v1203_v47, %v4689_v5  ;;  %v1239_v63 = vmul.f32 %v1231_v49, %v1231_v49  ;;  %v1230_v17 = vadd.f32 %v1229_v48, %v1228_v45  ;;  %v4880_v28 = vmul.f32 %v1178_v23, %v4689_v5 }
 0x365   :  { %v1237_v8 = vmul.f32 %v1221_v50, %v4689_v5  ;;  %v1241_v14 = vmul.f32 %v1233_v51, %v1233_v51  ;;  %v1236_v62 = vmul.f32 %v1212_v52, %v4689_v5  ;;  %v1240_v10 = vmul.f32 %v4875_v53, %v4875_v53 }
 0x366   :  { %v1243_v18 = vsub.f32 %v1235_v57, %v1239_v63  ;;  %v1238_v58 = vmul.f32 %v1230_v17, %v4689_v5  ;;  %v1242_v9 = vmul.f32 %v4880_v28, %v4880_v28  ;;  %v1336_v36 = vrot.slane %v1126_v6, %v4768_v60 }
 0x367   :  { %v1245_v29 = vsub.f32 %v1237_v8, %v1241_v14  ;;  %v1244_v34 = vsub.f32 %v1236_v62, %v1240_v10  ;;  %v4896_v5 = vrot.slane %v1126_v6, %v4774_v1  ;;  %v1291_v37 = vrot.slane %v1125_v7, %v4631_v56 }
 0x368   :  { %v1263_v31 = vadd.f32 0.8, %v1243_v18  ;;  %v1246_v4 = vsub.f32 %v1238_v58, %v1242_v9  ;;  %v1328_v38 = vrot.slane %v1126_v6, %v4631_v56  ;;  %v1299_v41 = vrot.slane %v1125_v7, %v4768_v60 }
 0x369   :  { %v1265_v33 = vadd.f32 0.8, %v1245_v29  ;;  %v1264_v13 = vadd.f32 0.8, %v1244_v34  ;;  %v4902_v42 = vrot.slane %v1125_v7, %v4636_v59  ;;  %v4905_v43 = vrot.slane %v1126_v6, %v4636_v59 }
 0x36a   :  { %3906 = vrsqrt.f32 %v1263_v31  ;;  %v1266_v35 = vadd.f32 0.8, %v1246_v4  ;;  %v4908_v44 = vrot.slane %v1125_v7, %v4774_v1  ;;  %v1247_v45 = vsub.f32 %v4784_v15, %v1231_v49 }
 0x36b   :  { %3908 = vrsqrt.f32 %v1265_v33  ;;  %v1251_v46 = vsub.f32 %v4802_v11, %v1231_v49  ;;  %v1255_v0 = vsub.f32 %v4822_v39, %v1231_v49  ;;  %v1259_v3 = vsub.f32 %v4848_v61, %v1231_v49 }
 0x36c   :  { %3910 = vrsqrt.f32 %v1264_v13  ;;  %v1249_v12 = vsub.f32 %v4786_v16, %v1233_v51  ;;  %v1253_v2 = vsub.f32 %v4804_v20, %v1233_v51  ;;  %v1257_v27 = vsub.f32 %v4824_v40, %v1233_v51 }
 0x36d   :  { %3912 = vrsqrt.f32 %v1266_v35  ;;  %v1261_v23 = vsub.f32 %v4850_v32, %v1233_v51  ;;  %v1248_v48 = vsub.f32 %v4789_v22, %v4875_v53  ;;  %v1252_v15 = vsub.f32 %v4807_v26, %v4875_v53 }
 0x36e   :  { %v1256_v11 = vsub.f32 %v4837_v54, %v4875_v53  ;;  %v1260_v39 = vsub.f32 %v4853_v21, %v4875_v53  ;;  %v1250_v16 = vsub.f32 %v4792_v24, %v4880_v28  ;;  %v1254_v20 = vsub.f32 %v4810_v30, %v4880_v28 }
 0x36f   :  { %v1258_v40 = vsub.f32 %v4840_v19, %v4880_v28  ;;  %v1262_v22 = vsub.f32 %v4856_v25, %v4880_v28 }
 0x377   :  { %v3907_v61 = vpop.eup %3906 }
 0x378   :  { %v3909_v26 = vpop.eup %3908  ;;  %v1271_v32 = vmul.f32 %v3907_v61, %v1247_v45  ;;  %v1275_v47 = vmul.f32 %v3907_v61, %v1251_v46  ;;  %v1279_v54 = vmul.f32 %v3907_v61, %v1255_v0  ;;  %v1283_v49 = vmul.f32 %v3907_v61, %v1259_v3 }
 0x379   :  { %v1273_v50 = vmul.f32 %v3909_v26, %v1249_v12  ;;  %v1277_v21 = vmul.f32 %v3909_v26, %v1253_v2  ;;  %v1281_v51 = vmul.f32 %v3909_v26, %v1257_v27  ;;  %v1285_v52 = vmul.f32 %v3909_v26, %v1261_v23  ;;  %v3911_v30 = vpop.eup %3910 }
 0x37a   :  { %v1308_v53 = vmul.f32 %v1291_v37, %v1271_v32  ;;  %v1312_v24 = vmul.f32 %v1291_v37, %v1275_v47  ;;  %v1316_v57 = vmul.f32 %v1291_v37, %v1279_v54  ;;  %v1320_v63 = vmul.f32 %v1291_v37, %v1283_v49 }
 0x37b   :  { %v1310_v8 = vmul.f32 %v1299_v41, %v1273_v50  ;;  %v1314_v14 = vmul.f32 %v1299_v41, %v1277_v21  ;;  %v1318_v19 = vmul.f32 %v1299_v41, %v1281_v51  ;;  %v1322_v17 = vmul.f32 %v1299_v41, %v1285_v52 }
 0x37c   :  { %v4934_v18 = vadd.f32 %v1328_v38, %v1308_v53  ;;  %v4936_v25 = vadd.f32 %v1328_v38, %v1312_v24  ;;  %v4938_v28 = vadd.f32 %v1328_v38, %v1316_v57  ;;  %v4940_v29 = vadd.f32 %v1328_v38, %v1320_v63 }
 0x37d   :  { %v4942_v62 = vadd.f32 %v1336_v36, %v1310_v8  ;;  %v4944_v10 = vadd.f32 %v1336_v36, %v1314_v14  ;;  %v4946_v31 = vadd.f32 %v1336_v36, %v1318_v19  ;;  %v4948_v33 = vadd.f32 %v1336_v36, %v1322_v17  ;;  %v3913_v36 = vpop.eup %3912 }
 0x37e   :  { %v4951_v34 = vmul.f32 0.2, %v4934_v18  ;;  %v4954_v58 = vmul.f32 0.2, %v4936_v25  ;;  %v4957_v9 = vmul.f32 0.2, %v4938_v28  ;;  %v1272_v13 = vmul.f32 %v3911_v30, %v1248_v48 }
 0x37f   :  { %v4960_v4 = vmul.f32 0.2, %v4940_v29  ;;  %v4963_v6 = vmul.f32 0.2, %v4942_v62  ;;  %v4966_v7 = vmul.f32 0.2, %v4944_v10  ;;  %v1276_v35 = vmul.f32 %v3911_v30, %v1252_v15 }
 0x380   :  { %v1377_v37 = vmax.f32 %v4934_v18, %v4951_v34  ;;  %v1381_v38 = vmax.f32 %v4936_v25, %v4954_v58  ;;  %v1385_v41 = vmax.f32 %v4938_v28, %v4957_v9  ;;  %v4975_v45 = vmul.f32 0.2, %v4946_v31 }
 0x381   :  { %v1389_v46 = vmax.f32 %v4940_v29, %v4960_v4  ;;  %v4980_v0 = vmul.f32 0.2, %v4948_v33  ;;  %v1379_v3 = vmax.f32 %v4942_v62, %v4963_v6  ;;  %v1383_v12 = vmax.f32 %v4944_v10, %v4966_v7 }
 0x382   :  { %v1387_v2 = vmax.f32 %v4946_v31, %v4975_v45  ;;  %v1280_v27 = vmul.f32 %v3911_v30, %v1256_v11  ;;  %v1284_v23 = vmul.f32 %v3911_v30, %v1260_v39  ;;  %v1309_v48 = vmul.f32 %v4902_v42, %v1272_v13 }
 0x383   :  { %v1391_v15 = vmax.f32 %v4948_v33, %v4980_v0  ;;  %v1313_v61 = vmul.f32 %v4902_v42, %v1276_v35  ;;  %v1274_v26 = vmul.f32 %v3913_v36, %v1250_v16  ;;  %v1278_v32 = vmul.f32 %v3913_v36, %v1254_v20 }
 0x384   :  { %v1317_v47 = vmul.f32 %v4902_v42, %v1280_v27  ;;  %v1321_v54 = vmul.f32 %v4902_v42, %v1284_v23  ;;  %v1346_v49 = vadd.f32 %v4905_v43, %v1309_v48  ;;  %v1282_v50 = vmul.f32 %v3913_v36, %v1258_v40 }
 0x385   :  { %v1350_v21 = vadd.f32 %v4905_v43, %v1313_v61  ;;  %v1286_v11 = vmul.f32 %v3913_v36, %v1262_v22  ;;  %v1311_v39 = vmul.f32 %v4908_v44, %v1274_v26  ;;  %v1315_v51 = vmul.f32 %v4908_v44, %v1278_v32 }
 0x386   :  { %v4999_v52 = vadd.f32 %v4905_v43, %v1317_v47  ;;  %v5002_v16 = vadd.f32 %v4905_v43, %v1321_v54  ;;  %v1362_v20 = vmul.f32 0.2, %v1346_v49  ;;  %v1319_v53 = vmul.f32 %v4908_v44, %v1282_v50 }
 0x387   :  { %v1366_v42 = vmul.f32 0.2, %v1350_v21  ;;  %v1323_v24 = vmul.f32 %v4908_v44, %v1286_v11  ;;  %v1348_v40 = vadd.f32 %v4896_v5, %v1311_v39  ;;  %v1352_v22 = vadd.f32 %v4896_v5, %v1315_v51 }
 0x388   :  { %v5009_v57 = vmul.f32 0.2, %v4999_v52  ;;  %v5012_v63 = vmul.f32 0.2, %v5002_v16  ;;  %v1378_v30 = vmax.f32 %v1346_v49, %v1362_v20  ;;  %v5015_v43 = vadd.f32 %v4896_v5, %v1319_v53 }
 0x389   :  { %v1382_v8 = vmax.f32 %v1350_v21, %v1366_v42  ;;  %v5018_v14 = vadd.f32 %v4896_v5, %v1323_v24  ;;  %v1364_v19 = vmul.f32 0.2, %v1348_v40  ;;  %v1368_v44 = vmul.f32 0.2, %v1352_v22 }
 0x38a   :  { %v1386_v17 = vmax.f32 %v4999_v52, %v5009_v57  ;;  %v1390_v13 = vmax.f32 %v5002_v16, %v5012_v63  ;;  %v5025_v35 = vmul.f32 0.2, %v5015_v43 }
 0x38b   :  { %v5028_v36 = vmul.f32 0.2, %v5018_v14  ;;  %v1380_v27 = vmax.f32 %v1348_v40, %v1364_v19  ;;  %v1384_v23 = vmax.f32 %v1352_v22, %v1368_v44 }
 0x38c   :  { %v1388_v5 = vmax.f32 %v5015_v43, %v5025_v35 }
 0x38d   :  { %v1392_v48 = vmax.f32 %v5018_v14, %v5028_v36 }
 0x38e   :  { %4480 = dma.done.wait [#allocation4 + $0x1], 28672 }
 0x38f   :  { %4481 = vsyncadd [#allocation4 + $0x1], 4294938624  ;;  %v5034_v61 = vpack.c.bf16 %v1382_v8, %v1378_v30  ;;  %v5036_v26 = vpack.c.bf16 %v1384_v23, %v1380_v27  ;;  %v3914_v32 = vld [vmem:[#allocation3 + $0x18c] ss:$28 sps:$4 sm:$0xff]   ;;  %v3920_v50 = vld [vmem:[#allocation3 + $0x154] ss:$28 sps:$4 sm:$0xff]   ;;  %v5062_v25 = vpack.c.bf16 %v1390_v13, %v1386_v17  ;;  %v5070_v62 = vpack.c.bf16 %v1392_v48, %v1388_v5 }
 0x390   :  { %v3916_v47 = vld [vmem:[#allocation3 + $0x50c] ss:$28 sps:$4 sm:$0xff]   ;;  %2850 = vmatprep.subr.bf16.mxu0 %v3914_v32  ;;  %v3922_v21 = vld [vmem:[#allocation3 + $0x4d4] ss:$28 sps:$4 sm:$0xff]   ;;  %v3926_v51 = vld [vmem:[#allocation3 + $0x11c] ss:$28 sps:$4 sm:$0xff]  }
 0x391   :  { %2882 = vmatprep.mubr.bf16.mxu0 %v5034_v61  ;;  %2935 = vmatprep.mubr.bf16.mxu1 %v5036_v26  ;;  %v3918_v54 = vld [vmem:[#allocation3 + $0x188] ss:$28 sps:$4 sm:$0xff]   ;;  %v3924_v11 = vld [vmem:[#allocation3 + $0x150] ss:$28 sps:$4 sm:$0xff]   ;;  %v3928_v20 = vld [vmem:[#allocation3 + $0x49c] ss:$28 sps:$4 sm:$0xff]  }
 0x392   :  { %v3919_v49 = vld [vmem:[#allocation3 + $0x508] ss:$28 sps:$4 sm:$0xff]   ;;  %2903 = vmatprep.subr.bf16.mxu1 %v3916_v47  ;;  %2851 = vmatpush1.bf16.msra.mxu0 %v3918_v54  ;;  %v3925_v39 = vld [vmem:[#allocation3 + $0x4d0] ss:$28 sps:$4 sm:$0xff]   ;;  %v3930_v53 = vld [vmem:[#allocation3 + $0x118] ss:$28 sps:$4 sm:$0xff]  }
 0x393   :  { %2904 = vmatpush1.bf16.msra.mxu1 %v3919_v49  ;;  %2852 = vmatprep.subr.bf16.mxu0 %v3920_v50  ;;  %v3931_v42 = vld [vmem:[#allocation3 + $0x498] ss:$28 sps:$4 sm:$0xff]   ;;  %v3932_v24 = vld [vmem:[#allocation3 + $0xe4] ss:$28 sps:$4 sm:$0xff]   ;;  %v3938_v8 = vld [vmem:[#allocation3 + $0xac] ss:$28 sps:$4 sm:$0xff]  }
 0x394   :  { %2905 = vmatprep.subr.bf16.mxu1 %v3922_v21  ;;  %v3934_v40 = vld [vmem:[#allocation3 + $0x464] ss:$28 sps:$4 sm:$0xff]   ;;  %v3940_v19 = vld [vmem:[#allocation3 + $0x42c] ss:$28 sps:$4 sm:$0xff]   ;;  %v3944_v23 = vld [vmem:[#allocation3 + $0x74] ss:$28 sps:$4 sm:$0xff]  }
 0x395   :  { %v3936_v22 = vld [vmem:[#allocation3 + $0xe0] ss:$28 sps:$4 sm:$0xff]   ;;  %v3942_v44 = vld [vmem:[#allocation3 + $0xa8] ss:$28 sps:$4 sm:$0xff]   ;;  %v3946_v32 = vld [vmem:[#allocation3 + $0x3f4] ss:$28 sps:$4 sm:$0xff]  }
 0x396   :  { %2853 = vmatpush1.bf16.msra.mxu0 %v3924_v11  ;;  %v3937_v30 = vld [vmem:[#allocation3 + $0x460] ss:$28 sps:$4 sm:$0xff]   ;;  %v3943_v27 = vld [vmem:[#allocation3 + $0x428] ss:$28 sps:$4 sm:$0xff]   ;;  %v3948_v47 = vld [vmem:[#allocation3 + $0x70] ss:$28 sps:$4 sm:$0xff]  }
 0x397   :  { %2906 = vmatpush1.bf16.msra.mxu1 %v3925_v39  ;;  %2854 = vmatprep.subr.bf16.mxu0 %v3926_v51  ;;  %v3949_v54 = vld [vmem:[#allocation3 + $0x3f0] ss:$28 sps:$4 sm:$0xff]   ;;  %v3950_v49 = vld [vmem:[#allocation3 + $0x3c] ss:$28 sps:$4 sm:$0xff]   ;;  %v3956_v39 = vld [vmem:[#allocation3 + $0x4] ss:$28 sps:$4 sm:$0xff]  }
 0x398   :  { %2907 = vmatprep.subr.bf16.mxu1 %v3928_v20  ;;  %v3952_v50 = vld [vmem:[#allocation3 + $0x3bc] ss:$28 sps:$4 sm:$0xff]   ;;  %v3958_v51 = vld [vmem:[#allocation3 + $0x384] ss:$28 sps:$4 sm:$0xff]   ;;  %v4033_v52 = vld [vmem:[#allocation3 + $0x46c] ss:$28 sps:$4 sm:$0xff]  }
 0x399   :  { %v3954_v21 = vld [vmem:[#allocation3 + $0x38] ss:$28 sps:$4 sm:$0xff]   ;;  %v3960_v20 = vld [vmem:[#allocation3] ss:$28 sps:$4 sm:$0xff]   ;;  %v4028_v28 = vld [vmem:[#allocation3 + $0xe8] ss:$28 sps:$4 sm:$0xff]  }
 0x39a   :  { %2855 = vmatpush1.bf16.msra.mxu0 %v3930_v53  ;;  %v3955_v11 = vld [vmem:[#allocation3 + $0x3b8] ss:$28 sps:$4 sm:$0xff]   ;;  %v3961_v53 = vld [vmem:[#allocation3 + $0x380] ss:$28 sps:$4 sm:$0xff]   ;;  %v4031_v9 = vld [vmem:[#allocation3 + $0x468] ss:$28 sps:$4 sm:$0xff]  }
 0x39b   :  { %2908 = vmatpush1.bf16.msra.mxu1 %v3931_v42  ;;  %2856 = vmatprep.subr.bf16.mxu0 %v3932_v24  ;;  %v3962_v42 = vld [vmem:[#allocation3 + $0x34c] ss:$28 sps:$4 sm:$0xff]   ;;  %v4021_v18 = vld [vmem:[#allocation3 + $0x4dc] ss:$28 sps:$4 sm:$0xff]   ;;  %v4024_v58 = vld [vmem:[#allocation3 + $0x124] ss:$28 sps:$4 sm:$0xff]  }
 0x39c   :  { %2909 = vmatprep.subr.bf16.mxu1 %v3934_v40  ;;  %v3964_v24 = vld [vmem:[#allocation3 + $0x6cc] ss:$28 sps:$4 sm:$0xff]   ;;  %v4016_v10 = vld [vmem:[#allocation3 + $0x158] ss:$28 sps:$4 sm:$0xff]   ;;  %v4027_v6 = vld [vmem:[#allocation3 + $0x4a4] ss:$28 sps:$4 sm:$0xff]  }
 0x39d   :  { %v3966_v40 = vld [vmem:[#allocation3 + $0x348] ss:$28 sps:$4 sm:$0xff]   ;;  %v4019_v34 = vld [vmem:[#allocation3 + $0x4d8] ss:$28 sps:$4 sm:$0xff]   ;;  %v4022_v7 = vld [vmem:[#allocation3 + $0x120] ss:$28 sps:$4 sm:$0xff]  }
 0x39e   :  { %2857 = vmatpush1.bf16.msra.mxu0 %v3936_v22  ;;  %v3967_v22 = vld [vmem:[#allocation3 + $0x6c8] ss:$28 sps:$4 sm:$0xff]   ;;  %v4036_v29 = vld [vmem:[#allocation3 + $0xb4] ss:$28 sps:$4 sm:$0xff]   ;;  %v4045_v45 = vld [vmem:[#allocation3 + $0x3fc] ss:$28 sps:$4 sm:$0xff]  }
 0x39f   :  { %2910 = vmatpush1.bf16.msra.mxu1 %v3937_v30  ;;  %2858 = vmatprep.subr.bf16.mxu0 %v3938_v8  ;;  %v3968_v30 = vld [vmem:[#allocation3 + $0x314] ss:$28 sps:$4 sm:$0xff]   ;;  %v4046_v16 = vld [vmem:[#allocation3 + $0x40] ss:$28 sps:$4 sm:$0xff]   ;;  %v4054_v63 = vld [vmem:[#allocation3 + $0xc] ss:$28 sps:$4 sm:$0xff]  }
 0x3a0   :  { %2911 = vmatprep.subr.bf16.mxu1 %v3940_v19  ;;  %v3970_v8 = vld [vmem:[#allocation3 + $0x694] ss:$28 sps:$4 sm:$0xff]   ;;  %v4049_v57 = vld [vmem:[#allocation3 + $0x3c0] ss:$28 sps:$4 sm:$0xff]   ;;  %v4057_v43 = vld [vmem:[#allocation3 + $0x38c] ss:$28 sps:$4 sm:$0xff]  }
 0x3a1   :  { %v3972_v19 = vld [vmem:[#allocation3 + $0x310] ss:$28 sps:$4 sm:$0xff]   ;;  %v4043_v0 = vld [vmem:[#allocation3 + $0x3f8] ss:$28 sps:$4 sm:$0xff]   ;;  %v4052_v14 = vld [vmem:[#allocation3 + $0x8] ss:$28 sps:$4 sm:$0xff]  }
 0x3a2   :  { %2859 = vmatpush1.bf16.msra.mxu0 %v3942_v44  ;;  %v3973_v44 = vld [vmem:[#allocation3 + $0x690] ss:$28 sps:$4 sm:$0xff]   ;;  %v4055_v17 = vld [vmem:[#allocation3 + $0x388] ss:$28 sps:$4 sm:$0xff]   ;;  %v4066_v48 = vld [vmem:[#allocation3 + $0x31c] ss:$28 sps:$4 sm:$0xff]  }
 0x3a3   :  { %2912 = vmatpush1.bf16.msra.mxu1 %v3943_v27  ;;  %2860 = vmatprep.subr.bf16.mxu0 %v3944_v23  ;;  %v3974_v27 = vld [vmem:[#allocation3 + $0x2dc] ss:$28 sps:$4 sm:$0xff]   ;;  %v4039_v31 = vld [vmem:[#allocation3 + $0x434] ss:$28 sps:$4 sm:$0xff]  }
 0x3a4   :  { %2913 = vmatprep.subr.bf16.mxu1 %v3946_v32  ;;  %v3976_v23 = vld [vmem:[#allocation3 + $0x65c] ss:$28 sps:$4 sm:$0xff]   ;;  %v4034_v33 = vld [vmem:[#allocation3 + $0xb0] ss:$28 sps:$4 sm:$0xff]  }
 0x3a5   :  { %v3978_v32 = vld [vmem:[#allocation3 + $0x2d8] ss:$28 sps:$4 sm:$0xff]   ;;  %v4037_v4 = vld [vmem:[#allocation3 + $0x430] ss:$28 sps:$4 sm:$0xff]  }
 0x3a6   :  { %2861 = vmatpush1.bf16.msra.mxu0 %v3948_v47  ;;  %v3979_v47 = vld [vmem:[#allocation3 + $0x658] ss:$28 sps:$4 sm:$0xff]   ;;  %v4058_v36 = vld [vmem:[#allocation3 + $0x350] ss:$28 sps:$4 sm:$0xff]  }
 0x3a7   :  { %2914 = vmatpush1.bf16.msra.mxu1 %v3949_v54  ;;  %2862 = vmatprep.subr.bf16.mxu0 %v3950_v49  ;;  %v3980_v54 = vld [vmem:[#allocation3 + $0x2a4] ss:$28 sps:$4 sm:$0xff]   ;;  %v4060_v13 = vld [vmem:[#allocation3 + $0x354] ss:$28 sps:$4 sm:$0xff]  }
 0x3a8   :  { %2915 = vmatprep.subr.bf16.mxu1 %v3952_v50  ;;  %v3982_v49 = vld [vmem:[#allocation3 + $0x624] ss:$28 sps:$4 sm:$0xff]   ;;  %v4063_v35 = vld [vmem:[#allocation3 + $0x6d4] ss:$28 sps:$4 sm:$0xff]  }
 0x3a9   :  { %v3984_v50 = vld [vmem:[#allocation3 + $0x2a0] ss:$28 sps:$4 sm:$0xff]   ;;  %v4061_v5 = vld [vmem:[#allocation3 + $0x6d0] ss:$28 sps:$4 sm:$0xff]  }
 0x3aa   :  { %2863 = vmatpush1.bf16.msra.mxu0 %v3954_v21  ;;  %v3985_v21 = vld [vmem:[#allocation3 + $0x620] ss:$28 sps:$4 sm:$0xff]  }
 0x3ab   :  { %2916 = vmatpush1.bf16.msra.mxu1 %v3955_v11  ;;  %2864 = vmatprep.subr.bf16.mxu0 %v3956_v39  ;;  %v3986_v11 = vld [vmem:[#allocation3 + $0x26c] ss:$28 sps:$4 sm:$0xff]  }
 0x3ac   :  { %2917 = vmatprep.subr.bf16.mxu1 %v3958_v51  ;;  %v3988_v39 = vld [vmem:[#allocation3 + $0x5ec] ss:$28 sps:$4 sm:$0xff]  }
 0x3ad   :  { %v3990_v51 = vld [vmem:[#allocation3 + $0x268] ss:$28 sps:$4 sm:$0xff]  }
 0x3ae   :  { %2865 = vmatpush1.bf16.msra.mxu0 %v3960_v20  ;;  %v3991_v20 = vld [vmem:[#allocation3 + $0x5e8] ss:$28 sps:$4 sm:$0xff]  }
 0x3af   :  { %2918 = vmatpush1.bf16.msra.mxu1 %v3961_v53  ;;  %2866 = vmatprep.subr.bf16.mxu0 %v3962_v42  ;;  %v3992_v53 = vld [vmem:[#allocation3 + $0x234] ss:$28 sps:$4 sm:$0xff]  }
 0x3b0   :  { %2919 = vmatprep.subr.bf16.mxu1 %v3964_v24  ;;  %v3994_v42 = vld [vmem:[#allocation3 + $0x5b4] ss:$28 sps:$4 sm:$0xff]  }
 0x3b1   :  { %v3996_v24 = vld [vmem:[#allocation3 + $0x230] ss:$28 sps:$4 sm:$0xff]  }
 0x3b2   :  { %2867 = vmatpush2.bf16.msra.mxu0 %v3966_v40  ;;  %v3997_v40 = vld [vmem:[#allocation3 + $0x5b0] ss:$28 sps:$4 sm:$0xff]  }
 0x3b3   :  { %2920 = vmatpush2.bf16.msra.mxu1 %v3967_v22  ;;  %2868 = vmatprep.subr.bf16.mxu0 %v3968_v30  ;;  %v3998_v22 = vld [vmem:[#allocation3 + $0x1fc] ss:$28 sps:$4 sm:$0xff]  }
 0x3b4   :  { %2921 = vmatprep.subr.bf16.mxu1 %v3970_v8  ;;  %v4000_v30 = vld [vmem:[#allocation3 + $0x57c] ss:$28 sps:$4 sm:$0xff]  }
 0x3b5   :  { %v4002_v8 = vld [vmem:[#allocation3 + $0x1f8] ss:$28 sps:$4 sm:$0xff]  }
 0x3b6   :  { %2869 = vmatpush2.bf16.msra.mxu0 %v3972_v19  ;;  %v4003_v19 = vld [vmem:[#allocation3 + $0x578] ss:$28 sps:$4 sm:$0xff]  }
 0x3b7   :  { %2922 = vmatpush2.bf16.msra.mxu1 %v3973_v44  ;;  %2870 = vmatprep.subr.bf16.mxu0 %v3974_v27  ;;  %v4004_v44 = vld [vmem:[#allocation3 + $0x1c4] ss:$28 sps:$4 sm:$0xff]  }
 0x3b8   :  { %2923 = vmatprep.subr.bf16.mxu1 %v3976_v23  ;;  %v4006_v27 = vld [vmem:[#allocation3 + $0x544] ss:$28 sps:$4 sm:$0xff]  }
 0x3b9   :  { %v4008_v23 = vld [vmem:[#allocation3 + $0x1c0] ss:$28 sps:$4 sm:$0xff]  }
 0x3ba   :  { %2871 = vmatpush2.bf16.msra.mxu0 %v3978_v32  ;;  %v4009_v32 = vld [vmem:[#allocation3 + $0x540] ss:$28 sps:$4 sm:$0xff]  }
 0x3bb   :  { %2924 = vmatpush2.bf16.msra.mxu1 %v3979_v47  ;;  %2872 = vmatprep.subr.bf16.mxu0 %v3980_v54  ;;  %v4012_v47 = vld [vmem:[#allocation3 + $0x194] ss:$28 sps:$4 sm:$0xff]  }
 0x3bc   :  { %2925 = vmatprep.subr.bf16.mxu1 %v3982_v49  ;;  %v4015_v54 = vld [vmem:[#allocation3 + $0x514] ss:$28 sps:$4 sm:$0xff]   ;;  %v5046_v49 = vpack.c.bf16 %v1381_v38, %v1377_v37  ;;  %v4025_v37 = vld [vmem:[#allocation3 + $0x4a0] ss:$28 sps:$4 sm:$0xff]   ;;  %v5082_v38 = vpack.c.bf16 %v1389_v46, %v1385_v41 }
 0x3bd   :  { %v4042_v41 = vld [vmem:[#allocation3 + $0x7c] ss:$28 sps:$4 sm:$0xff]  }
 0x3be   :  { %2873 = vmatpush2.bf16.msra.mxu0 %v3984_v50  ;;  %v5054_v50 = vpack.c.bf16 %v1383_v12, %v1379_v3  ;;  %v5090_v3 = vpack.c.bf16 %v1391_v15, %v1387_v2  ;;  %v4030_v12 = vld [vmem:[#allocation3 + $0xec] ss:$28 sps:$4 sm:$0xff]   ;;  %v4040_v46 = vld [vmem:[#allocation3 + $0x78] ss:$28 sps:$4 sm:$0xff]   ;;  %v4048_v2 = vld [vmem:[#allocation3 + $0x44] ss:$28 sps:$4 sm:$0xff]  }
 0x3bf   :  { %2926 = vmatpush2.bf16.msra.mxu1 %v3985_v21  ;;  %2874 = vmatprep.subr.bf16.mxu0 %v3986_v11  ;;  %v4010_v21 = vld [vmem:[#allocation3 + $0x190] ss:$28 sps:$4 sm:$0xff]   ;;  %v4051_v15 = vld [vmem:[#allocation3 + $0x3c4] ss:$28 sps:$4 sm:$0xff]  }
 0x3c0   :  { %2927 = vmatprep.subr.bf16.mxu1 %v3988_v39  ;;  %v4013_v11 = vld [vmem:[#allocation3 + $0x510] ss:$28 sps:$4 sm:$0xff]   ;;  %v4018_v39 = vld [vmem:[#allocation3 + $0x15c] ss:$28 sps:$4 sm:$0xff]  }
 0x3c2   :  { %2875 = vmatpush2.bf16.msra.mxu0 %v3990_v51  ;;  %v4069_v51 = vld [vmem:[#allocation3 + $0x69c] ss:$28 sps:$4 sm:$0xff]  }
 0x3c3   :  { %2928 = vmatpush2.bf16.msra.mxu1 %v3991_v20  ;;  %2876 = vmatprep.subr.bf16.mxu0 %v3992_v53  ;;  %v4064_v20 = vld [vmem:[#allocation3 + $0x318] ss:$28 sps:$4 sm:$0xff]  }
 0x3c4   :  { %2929 = vmatprep.subr.bf16.mxu1 %v3994_v42  ;;  %v4067_v53 = vld [vmem:[#allocation3 + $0x698] ss:$28 sps:$4 sm:$0xff]   ;;  %v4072_v42 = vld [vmem:[#allocation3 + $0x2e4] ss:$28 sps:$4 sm:$0xff]  }
 0x3c6   :  { %2877 = vmatpush2.bf16.msra.mxu0 %v3996_v24  ;;  %v4075_v24 = vld [vmem:[#allocation3 + $0x664] ss:$28 sps:$4 sm:$0xff]  }
 0x3c7   :  { %2930 = vmatpush2.bf16.msra.mxu1 %v3997_v40  ;;  %2878 = vmatprep.subr.bf16.mxu0 %v3998_v22  ;;  %v4070_v40 = vld [vmem:[#allocation3 + $0x2e0] ss:$28 sps:$4 sm:$0xff]  }
 0x3c8   :  { %2931 = vmatprep.subr.bf16.mxu1 %v4000_v30  ;;  %v4073_v22 = vld [vmem:[#allocation3 + $0x660] ss:$28 sps:$4 sm:$0xff]   ;;  %v4078_v30 = vld [vmem:[#allocation3 + $0x2ac] ss:$28 sps:$4 sm:$0xff]  }
 0x3ca   :  { %2879 = vmatpush2.bf16.msra.mxu0 %v4002_v8  ;;  %v4081_v8 = vld [vmem:[#allocation3 + $0x62c] ss:$28 sps:$4 sm:$0xff]  }
 0x3cb   :  { %2932 = vmatpush2.bf16.msra.mxu1 %v4003_v19  ;;  %2880 = vmatprep.subr.bf16.mxu0 %v4004_v44  ;;  %v4076_v19 = vld [vmem:[#allocation3 + $0x2a8] ss:$28 sps:$4 sm:$0xff]  }
 0x3cc   :  { %2933 = vmatprep.subr.bf16.mxu1 %v4006_v27  ;;  %v4079_v44 = vld [vmem:[#allocation3 + $0x628] ss:$28 sps:$4 sm:$0xff]   ;;  %v4084_v27 = vld [vmem:[#allocation3 + $0x274] ss:$28 sps:$4 sm:$0xff]  }
 0x3ce   :  { %2881 = vmatpush2.bf16.msra.mxu0 %v4008_v23  ;;  %v4087_v23 = vld [vmem:[#allocation3 + $0x5f4] ss:$28 sps:$4 sm:$0xff]  }
 0x3cf   :  { %2934 = vmatpush2.bf16.msra.mxu1 %v4009_v32  ;;  %2956 = vmatprep.subr.bf16.mxu0 %v4012_v47  ;;  %v4082_v32 = vld [vmem:[#allocation3 + $0x270] ss:$28 sps:$4 sm:$0xff]  }
 0x3d0   :  { %3009 = vmatprep.subr.bf16.mxu1 %v4015_v54  ;;  %v4085_v47 = vld [vmem:[#allocation3 + $0x5f0] ss:$28 sps:$4 sm:$0xff]   ;;  %v4090_v54 = vld [vmem:[#allocation3 + $0x23c] ss:$28 sps:$4 sm:$0xff]  }
 0x3d1   :  { %2883 = vmatmul.mubr.bf16.vlgmr.msra.gmra.mxu0 %v5046_v49 }
 0x3d2   :  { %2936 = vmatmul.mubr.bf16.vlgmr.msra.gmra.mxu1 %v5054_v50  ;;  %2957 = vmatpush1.bf16.msra.mxu0 %v4010_v21  ;;  %v4093_v21 = vld [vmem:[#allocation3 + $0x5bc] ss:$28 sps:$4 sm:$0xff]  }
 0x3d3   :  { %3010 = vmatpush1.bf16.msra.mxu1 %v4013_v11  ;;  %2958 = vmatprep.subr.bf16.mxu0 %v4018_v39  ;;  %v4088_v11 = vld [vmem:[#allocation3 + $0x238] ss:$28 sps:$4 sm:$0xff]  }
 0x3d4   :  { %3011 = vmatprep.subr.bf16.mxu1 %v4021_v18  ;;  %2892 = vmatprep.mubr.bf16.mxu0 %v5062_v25  ;;  %v4091_v39 = vld [vmem:[#allocation3 + $0x5b8] ss:$28 sps:$4 sm:$0xff]   ;;  %v4096_v18 = vld [vmem:[#allocation3 + $0x204] ss:$28 sps:$4 sm:$0xff]  }
 0x3d5   :  { %2945 = vmatprep.mubr.bf16.mxu1 %v5070_v62 }
 0x3d6   :  { %2959 = vmatpush1.bf16.msra.mxu0 %v4016_v10  ;;  %v4099_v10 = vld [vmem:[#allocation3 + $0x584] ss:$28 sps:$4 sm:$0xff]  }
 0x3d7   :  { %3012 = vmatpush1.bf16.msra.mxu1 %v4019_v34  ;;  %2960 = vmatprep.subr.bf16.mxu0 %v4024_v58  ;;  %v4094_v34 = vld [vmem:[#allocation3 + $0x200] ss:$28 sps:$4 sm:$0xff]  }
 0x3d8   :  { %3013 = vmatprep.subr.bf16.mxu1 %v4027_v6  ;;  %v4097_v58 = vld [vmem:[#allocation3 + $0x580] ss:$28 sps:$4 sm:$0xff]   ;;  %v4102_v6 = vld [vmem:[#allocation3 + $0x1cc] ss:$28 sps:$4 sm:$0xff]  }
 0x3d9   :  { %2893 = vmatmul.mubr.bf16.gmra.mxu0 %v5082_v38 }
 0x3da   :  { %2946 = vmatmul.mubr.bf16.gmra.mxu1 %v5090_v3  ;;  %2961 = vmatpush1.bf16.msra.mxu0 %v4022_v7  ;;  %v4105_v7 = vld [vmem:[#allocation3 + $0x54c] ss:$28 sps:$4 sm:$0xff]  }
 0x3db   :  { %3014 = vmatpush1.bf16.msra.mxu1 %v4025_v37  ;;  %2962 = vmatprep.subr.bf16.mxu0 %v4030_v12  ;;  %v4100_v37 = vld [vmem:[#allocation3 + $0x1c8] ss:$28 sps:$4 sm:$0xff]  }
 0x3dc   :  { %3015 = vmatprep.subr.bf16.mxu1 %v4033_v52  ;;  %2988 = vmatprep.mubr.bf16.mxu0 %v5034_v61  ;;  %v4103_v12 = vld [vmem:[#allocation3 + $0x548] ss:$28 sps:$4 sm:$0xff]   ;;  %v4108_v52 = vld [vmem:[#allocation3 + $0x19c] ss:$28 sps:$4 sm:$0xff]  }
 0x3dd   :  { %3041 = vmatprep.mubr.bf16.mxu1 %v5036_v26 }
 0x3de   :  { %2963 = vmatpush1.bf16.msra.mxu0 %v4028_v28  ;;  %v4111_v28 = vld [vmem:[#allocation3 + $0x51c] ss:$28 sps:$4 sm:$0xff]  }
 0x3df   :  { %3016 = vmatpush1.bf16.msra.mxu1 %v4031_v9  ;;  %2964 = vmatprep.subr.bf16.mxu0 %v4036_v29  ;;  %v4106_v9 = vld [vmem:[#allocation3 + $0x198] ss:$28 sps:$4 sm:$0xff]  }
 0x3e0   :  { %3017 = vmatprep.subr.bf16.mxu1 %v4039_v31  ;;  %v4109_v29 = vld [vmem:[#allocation3 + $0x518] ss:$28 sps:$4 sm:$0xff]   ;;  %v4114_v31 = vld [vmem:[#allocation3 + $0x164] ss:$28 sps:$4 sm:$0xff]  }
 0x3e2   :  { %2965 = vmatpush1.bf16.msra.mxu0 %v4034_v33  ;;  %v4117_v33 = vld [vmem:[#allocation3 + $0x4e4] ss:$28 sps:$4 sm:$0xff]  }
 0x3e3   :  { %3018 = vmatpush1.bf16.msra.mxu1 %v4037_v4  ;;  %2966 = vmatprep.subr.bf16.mxu0 %v4042_v41  ;;  %v4112_v4 = vld [vmem:[#allocation3 + $0x160] ss:$28 sps:$4 sm:$0xff]  }
 0x3e4   :  { %3019 = vmatprep.subr.bf16.mxu1 %v4045_v45  ;;  %v4115_v41 = vld [vmem:[#allocation3 + $0x4e0] ss:$28 sps:$4 sm:$0xff]   ;;  %v4120_v45 = vld [vmem:[#allocation3 + $0x12c] ss:$28 sps:$4 sm:$0xff]  }
 0x3e6   :  { %2967 = vmatpush1.bf16.msra.mxu0 %v4040_v46  ;;  %v4123_v46 = vld [vmem:[#allocation3 + $0x4ac] ss:$28 sps:$4 sm:$0xff]  }
 0x3e7   :  { %3020 = vmatpush1.bf16.msra.mxu1 %v4043_v0  ;;  %2968 = vmatprep.subr.bf16.mxu0 %v4048_v2  ;;  %v4118_v0 = vld [vmem:[#allocation3 + $0x128] ss:$28 sps:$4 sm:$0xff]  }
 0x3e8   :  { %3021 = vmatprep.subr.bf16.mxu1 %v4051_v15  ;;  %v4121_v2 = vld [vmem:[#allocation3 + $0x4a8] ss:$28 sps:$4 sm:$0xff]   ;;  %v4126_v15 = vld [vmem:[#allocation3 + $0xf4] ss:$28 sps:$4 sm:$0xff]  }
 0x3ea   :  { %2969 = vmatpush1.bf16.msra.mxu0 %v4046_v16  ;;  %v4129_v16 = vld [vmem:[#allocation3 + $0x474] ss:$28 sps:$4 sm:$0xff]  }
 0x3eb   :  { %3022 = vmatpush1.bf16.msra.mxu1 %v4049_v57  ;;  %2970 = vmatprep.subr.bf16.mxu0 %v4054_v63  ;;  %v4124_v57 = vld [vmem:[#allocation3 + $0xf0] ss:$28 sps:$4 sm:$0xff]  }
 0x3ec   :  { %3023 = vmatprep.subr.bf16.mxu1 %v4057_v43  ;;  %v4127_v63 = vld [vmem:[#allocation3 + $0x470] ss:$28 sps:$4 sm:$0xff]   ;;  %v4132_v43 = vld [vmem:[#allocation3 + $0xbc] ss:$28 sps:$4 sm:$0xff]  }
 0x3ee   :  { %2971 = vmatpush1.bf16.msra.mxu0 %v4052_v14  ;;  %v4135_v14 = vld [vmem:[#allocation3 + $0x43c] ss:$28 sps:$4 sm:$0xff]  }
 0x3ef   :  { %3024 = vmatpush1.bf16.msra.mxu1 %v4055_v17  ;;  %2972 = vmatprep.subr.bf16.mxu0 %v4060_v13  ;;  %v4130_v17 = vld [vmem:[#allocation3 + $0xb8] ss:$28 sps:$4 sm:$0xff]  }
 0x3f0   :  { %3025 = vmatprep.subr.bf16.mxu1 %v4063_v35  ;;  %v4133_v13 = vld [vmem:[#allocation3 + $0x438] ss:$28 sps:$4 sm:$0xff]   ;;  %v4138_v35 = vld [vmem:[#allocation3 + $0x84] ss:$28 sps:$4 sm:$0xff]  }
 0x3f2   :  { %2973 = vmatpush2.bf16.msra.mxu0 %v4058_v36  ;;  %v4141_v36 = vld [vmem:[#allocation3 + $0x404] ss:$28 sps:$4 sm:$0xff]  }
 0x3f3   :  { %3026 = vmatpush2.bf16.msra.mxu1 %v4061_v5  ;;  %2974 = vmatprep.subr.bf16.mxu0 %v4066_v48  ;;  %v4136_v5 = vld [vmem:[#allocation3 + $0x80] ss:$28 sps:$4 sm:$0xff]  }
 0x3f4   :  { %3027 = vmatprep.subr.bf16.mxu1 %v4069_v51  ;;  %v4139_v48 = vld [vmem:[#allocation3 + $0x400] ss:$28 sps:$4 sm:$0xff]   ;;  %v4144_v51 = vld [vmem:[#allocation3 + $0x4c] ss:$28 sps:$4 sm:$0xff]  }
 0x3f6   :  { %2975 = vmatpush2.bf16.msra.mxu0 %v4064_v20  ;;  %v4147_v20 = vld [vmem:[#allocation3 + $0x3cc] ss:$28 sps:$4 sm:$0xff]  }
 0x3f7   :  { %3028 = vmatpush2.bf16.msra.mxu1 %v4067_v53  ;;  %2976 = vmatprep.subr.bf16.mxu0 %v4072_v42  ;;  %v4142_v53 = vld [vmem:[#allocation3 + $0x48] ss:$28 sps:$4 sm:$0xff]  }
 0x3f8   :  { %3029 = vmatprep.subr.bf16.mxu1 %v4075_v24  ;;  %v4145_v42 = vld [vmem:[#allocation3 + $0x3c8] ss:$28 sps:$4 sm:$0xff]   ;;  %v4150_v24 = vld [vmem:[#allocation3 + $0x14] ss:$28 sps:$4 sm:$0xff]  }
 0x3fa   :  { %2977 = vmatpush2.bf16.msra.mxu0 %v4070_v40  ;;  %v4153_v40 = vld [vmem:[#allocation3 + $0x394] ss:$28 sps:$4 sm:$0xff]  }
 0x3fb   :  { %3030 = vmatpush2.bf16.msra.mxu1 %v4073_v22  ;;  %2978 = vmatprep.subr.bf16.mxu0 %v4078_v30  ;;  %v4148_v22 = vld [vmem:[#allocation3 + $0x10] ss:$28 sps:$4 sm:$0xff]  }
 0x3fc   :  { %3031 = vmatprep.subr.bf16.mxu1 %v4081_v8  ;;  %v4151_v30 = vld [vmem:[#allocation3 + $0x390] ss:$28 sps:$4 sm:$0xff]   ;;  %v4156_v8 = vld [vmem:[#allocation3 + $0x35c] ss:$28 sps:$4 sm:$0xff]  }
 0x3fe   :  { %2979 = vmatpush2.bf16.msra.mxu0 %v4076_v19  ;;  %v4159_v19 = vld [vmem:[#allocation3 + $0x6dc] ss:$28 sps:$4 sm:$0xff]  }
 0x3ff   :  { %3032 = vmatpush2.bf16.msra.mxu1 %v4079_v44  ;;  %2980 = vmatprep.subr.bf16.mxu0 %v4084_v27  ;;  %v4154_v44 = vld [vmem:[#allocation3 + $0x358] ss:$28 sps:$4 sm:$0xff]  }
 0x400   :  { %3033 = vmatprep.subr.bf16.mxu1 %v4087_v23  ;;  %v4157_v27 = vld [vmem:[#allocation3 + $0x6d8] ss:$28 sps:$4 sm:$0xff]   ;;  %v4162_v23 = vld [vmem:[#allocation3 + $0x324] ss:$28 sps:$4 sm:$0xff]  }
 0x402   :  { %2981 = vmatpush2.bf16.msra.mxu0 %v4082_v32  ;;  %v4165_v32 = vld [vmem:[#allocation3 + $0x6a4] ss:$28 sps:$4 sm:$0xff]  }
 0x403   :  { %3034 = vmatpush2.bf16.msra.mxu1 %v4085_v47  ;;  %2982 = vmatprep.subr.bf16.mxu0 %v4090_v54  ;;  %v4160_v47 = vld [vmem:[#allocation3 + $0x320] ss:$28 sps:$4 sm:$0xff]  }
 0x404   :  { %3035 = vmatprep.subr.bf16.mxu1 %v4093_v21  ;;  %v4163_v54 = vld [vmem:[#allocation3 + $0x6a0] ss:$28 sps:$4 sm:$0xff]   ;;  %v4168_v21 = vld [vmem:[#allocation3 + $0x2ec] ss:$28 sps:$4 sm:$0xff]  }
 0x406   :  { %2983 = vmatpush2.bf16.msra.mxu0 %v4088_v11  ;;  %v4171_v11 = vld [vmem:[#allocation3 + $0x66c] ss:$28 sps:$4 sm:$0xff]  }
 0x407   :  { %3036 = vmatpush2.bf16.msra.mxu1 %v4091_v39  ;;  %2984 = vmatprep.subr.bf16.mxu0 %v4096_v18  ;;  %v4166_v39 = vld [vmem:[#allocation3 + $0x2e8] ss:$28 sps:$4 sm:$0xff]  }
 0x408   :  { %3037 = vmatprep.subr.bf16.mxu1 %v4099_v10  ;;  %v4169_v18 = vld [vmem:[#allocation3 + $0x668] ss:$28 sps:$4 sm:$0xff]   ;;  %v4174_v10 = vld [vmem:[#allocation3 + $0x2b4] ss:$28 sps:$4 sm:$0xff]  }
 0x40a   :  { %2985 = vmatpush2.bf16.msra.mxu0 %v4094_v34  ;;  %v4177_v34 = vld [vmem:[#allocation3 + $0x634] ss:$28 sps:$4 sm:$0xff]  }
 0x40b   :  { %3038 = vmatpush2.bf16.msra.mxu1 %v4097_v58  ;;  %2986 = vmatprep.subr.bf16.mxu0 %v4102_v6  ;;  %v4172_v58 = vld [vmem:[#allocation3 + $0x2b0] ss:$28 sps:$4 sm:$0xff]  }
 0x40c   :  { %3039 = vmatprep.subr.bf16.mxu1 %v4105_v7  ;;  %v4175_v6 = vld [vmem:[#allocation3 + $0x630] ss:$28 sps:$4 sm:$0xff]   ;;  %v4180_v7 = vld [vmem:[#allocation3 + $0x27c] ss:$28 sps:$4 sm:$0xff]  }
 0x40e   :  { %2987 = vmatpush2.bf16.msra.mxu0 %v4100_v37  ;;  %v4183_v37 = vld [vmem:[#allocation3 + $0x5fc] ss:$28 sps:$4 sm:$0xff]  }
 0x40f   :  { %3040 = vmatpush2.bf16.msra.mxu1 %v4103_v12  ;;  %3062 = vmatprep.subr.bf16.mxu0 %v4108_v52  ;;  %v4178_v12 = vld [vmem:[#allocation3 + $0x278] ss:$28 sps:$4 sm:$0xff]  }
 0x410   :  { %3115 = vmatprep.subr.bf16.mxu1 %v4111_v28  ;;  %v4181_v52 = vld [vmem:[#allocation3 + $0x5f8] ss:$28 sps:$4 sm:$0xff]   ;;  %v4186_v28 = vld [vmem:[#allocation3 + $0x244] ss:$28 sps:$4 sm:$0xff]  }
 0x411   :  { %2989 = vmatmul.mubr.bf16.vlgmr.msra.gmra.mxu0 %v5046_v49 }
 0x412   :  { %3042 = vmatmul.mubr.bf16.vlgmr.msra.gmra.mxu1 %v5054_v50  ;;  %3063 = vmatpush1.bf16.msra.mxu0 %v4106_v9  ;;  %v4189_v9 = vld [vmem:[#allocation3 + $0x5c4] ss:$28 sps:$4 sm:$0xff]  }
 0x413   :  { %3116 = vmatpush1.bf16.msra.mxu1 %v4109_v29  ;;  %3064 = vmatprep.subr.bf16.mxu0 %v4114_v31  ;;  %v4184_v29 = vld [vmem:[#allocation3 + $0x240] ss:$28 sps:$4 sm:$0xff]  }
 0x414   :  { %3117 = vmatprep.subr.bf16.mxu1 %v4117_v33  ;;  %2998 = vmatprep.mubr.bf16.mxu0 %v5062_v25  ;;  %v4187_v31 = vld [vmem:[#allocation3 + $0x5c0] ss:$28 sps:$4 sm:$0xff]   ;;  %v4192_v33 = vld [vmem:[#allocation3 + $0x20c] ss:$28 sps:$4 sm:$0xff]  }
 0x415   :  { %3051 = vmatprep.mubr.bf16.mxu1 %v5070_v62 }
 0x416   :  { %3065 = vmatpush1.bf16.msra.mxu0 %v4112_v4  ;;  %v4195_v4 = vld [vmem:[#allocation3 + $0x58c] ss:$28 sps:$4 sm:$0xff]  }
 0x417   :  { %3118 = vmatpush1.bf16.msra.mxu1 %v4115_v41  ;;  %3066 = vmatprep.subr.bf16.mxu0 %v4120_v45  ;;  %v4190_v41 = vld [vmem:[#allocation3 + $0x208] ss:$28 sps:$4 sm:$0xff]  }
 0x418   :  { %3119 = vmatprep.subr.bf16.mxu1 %v4123_v46  ;;  %v4193_v45 = vld [vmem:[#allocation3 + $0x588] ss:$28 sps:$4 sm:$0xff]   ;;  %v4198_v46 = vld [vmem:[#allocation3 + $0x1d4] ss:$28 sps:$4 sm:$0xff]  }
 0x419   :  { %2999 = vmatmul.mubr.bf16.gmra.mxu0 %v5082_v38 }
 0x41a   :  { %3052 = vmatmul.mubr.bf16.gmra.mxu1 %v5090_v3  ;;  %3067 = vmatpush1.bf16.msra.mxu0 %v4118_v0  ;;  %v4201_v0 = vld [vmem:[#allocation3 + $0x554] ss:$28 sps:$4 sm:$0xff]  }
 0x41b   :  { %3120 = vmatpush1.bf16.msra.mxu1 %v4121_v2  ;;  %3068 = vmatprep.subr.bf16.mxu0 %v4126_v15  ;;  %v4196_v2 = vld [vmem:[#allocation3 + $0x1d0] ss:$28 sps:$4 sm:$0xff]  }
 0x41c   :  { %3121 = vmatprep.subr.bf16.mxu1 %v4129_v16  ;;  %3094 = vmatprep.mubr.bf16.mxu0 %v5034_v61  ;;  %v4199_v15 = vld [vmem:[#allocation3 + $0x550] ss:$28 sps:$4 sm:$0xff]   ;;  %v4202_v16 = vld [vmem:[#allocation3 + $0x360] ss:$28 sps:$4 sm:$0xff]  }
 0x41d   :  { %3147 = vmatprep.mubr.bf16.mxu1 %v5036_v26 }
 0x41e   :  { %3069 = vmatpush1.bf16.msra.mxu0 %v4124_v57  ;;  %v4203_v57 = vld [vmem:[#allocation3 + $0x6e0] ss:$28 sps:$4 sm:$0xff]  }
 0x41f   :  { %3122 = vmatpush1.bf16.msra.mxu1 %v4127_v63  ;;  %3070 = vmatprep.subr.bf16.mxu0 %v4132_v43  ;;  %v4204_v63 = vld [vmem:[#allocation3 + $0x1a0] ss:$28 sps:$4 sm:$0xff]  }
 0x420   :  { %3123 = vmatprep.subr.bf16.mxu1 %v4135_v14  ;;  %v4205_v43 = vld [vmem:[#allocation3 + $0x520] ss:$28 sps:$4 sm:$0xff]   ;;  %v4206_v14 = vld [vmem:[#allocation3 + $0x328] ss:$28 sps:$4 sm:$0xff]  }
 0x422   :  { %3071 = vmatpush1.bf16.msra.mxu0 %v4130_v17  ;;  %v4207_v17 = vld [vmem:[#allocation3 + $0x6a8] ss:$28 sps:$4 sm:$0xff]  }
 0x423   :  { %3124 = vmatpush1.bf16.msra.mxu1 %v4133_v13  ;;  %3072 = vmatprep.subr.bf16.mxu0 %v4138_v35  ;;  %v4208_v13 = vld [vmem:[#allocation3 + $0x168] ss:$28 sps:$4 sm:$0xff]  }
 0x424   :  { %3125 = vmatprep.subr.bf16.mxu1 %v4141_v36  ;;  %v4209_v35 = vld [vmem:[#allocation3 + $0x4e8] ss:$28 sps:$4 sm:$0xff]   ;;  %v4210_v36 = vld [vmem:[#allocation3 + $0x2f0] ss:$28 sps:$4 sm:$0xff]  }
 0x426   :  { %3073 = vmatpush1.bf16.msra.mxu0 %v4136_v5  ;;  %v4211_v5 = vld [vmem:[#allocation3 + $0x670] ss:$28 sps:$4 sm:$0xff]  }
 0x427   :  { %3126 = vmatpush1.bf16.msra.mxu1 %v4139_v48  ;;  %3074 = vmatprep.subr.bf16.mxu0 %v4144_v51  ;;  %v4212_v48 = vld [vmem:[#allocation3 + $0x130] ss:$28 sps:$4 sm:$0xff]  }
 0x428   :  { %3127 = vmatprep.subr.bf16.mxu1 %v4147_v20  ;;  %v4213_v51 = vld [vmem:[#allocation3 + $0x4b0] ss:$28 sps:$4 sm:$0xff]   ;;  %v4214_v20 = vld [vmem:[#allocation3 + $0x2b8] ss:$28 sps:$4 sm:$0xff]  }
 0x42a   :  { %3075 = vmatpush1.bf16.msra.mxu0 %v4142_v53  ;;  %v4215_v53 = vld [vmem:[#allocation3 + $0x638] ss:$28 sps:$4 sm:$0xff]  }
 0x42b   :  { %3128 = vmatpush1.bf16.msra.mxu1 %v4145_v42  ;;  %3076 = vmatprep.subr.bf16.mxu0 %v4150_v24  ;;  %v4216_v42 = vld [vmem:[#allocation3 + $0xf8] ss:$28 sps:$4 sm:$0xff]  }
 0x42c   :  { %3129 = vmatprep.subr.bf16.mxu1 %v4153_v40  ;;  %v4217_v24 = vld [vmem:[#allocation3 + $0x478] ss:$28 sps:$4 sm:$0xff]   ;;  %v4218_v40 = vld [vmem:[#allocation3 + $0x280] ss:$28 sps:$4 sm:$0xff]  }
 0x42e   :  { %3077 = vmatpush1.bf16.msra.mxu0 %v4148_v22  ;;  %v4219_v22 = vld [vmem:[#allocation3 + $0x600] ss:$28 sps:$4 sm:$0xff]  }
 0x42f   :  { %3130 = vmatpush1.bf16.msra.mxu1 %v4151_v30  ;;  %3078 = vmatprep.subr.bf16.mxu0 %v4156_v8  ;;  %v4220_v30 = vld [vmem:[#allocation3 + $0xc0] ss:$28 sps:$4 sm:$0xff]  }
 0x430   :  { %3131 = vmatprep.subr.bf16.mxu1 %v4159_v19  ;;  %v4221_v8 = vld [vmem:[#allocation3 + $0x440] ss:$28 sps:$4 sm:$0xff]   ;;  %v4222_v19 = vld [vmem:[#allocation3 + $0x248] ss:$28 sps:$4 sm:$0xff]  }
 0x432   :  { %3079 = vmatpush2.bf16.msra.mxu0 %v4154_v44  ;;  %v4223_v44 = vld [vmem:[#allocation3 + $0x5c8] ss:$28 sps:$4 sm:$0xff]  }
 0x433   :  { %3132 = vmatpush2.bf16.msra.mxu1 %v4157_v27  ;;  %3080 = vmatprep.subr.bf16.mxu0 %v4162_v23  ;;  %v4224_v27 = vld [vmem:[#allocation3 + $0x88] ss:$28 sps:$4 sm:$0xff]  }
 0x434   :  { %3133 = vmatprep.subr.bf16.mxu1 %v4165_v32  ;;  %v4225_v23 = vld [vmem:[#allocation3 + $0x408] ss:$28 sps:$4 sm:$0xff]   ;;  %v4226_v32 = vld [vmem:[#allocation3 + $0x210] ss:$28 sps:$4 sm:$0xff]  }
 0x436   :  { %3081 = vmatpush2.bf16.msra.mxu0 %v4160_v47  ;;  %v4227_v47 = vld [vmem:[#allocation3 + $0x590] ss:$28 sps:$4 sm:$0xff]  }
 0x437   :  { %3134 = vmatpush2.bf16.msra.mxu1 %v4163_v54  ;;  %3082 = vmatprep.subr.bf16.mxu0 %v4168_v21  ;;  %v4230_v54 = vld [vmem:[#allocation3 + $0x1d8] ss:$28 sps:$4 sm:$0xff]  }
 0x438   :  { %3135 = vmatprep.subr.bf16.mxu1 %v4171_v11  ;;  %v4231_v21 = vld [vmem:[#allocation3 + $0x558] ss:$28 sps:$4 sm:$0xff]  }
 0x439   :  { %v4232_v11 = vld [vmem:[#allocation3 + $0x18] ss:$28 sps:$4 sm:$0xff]  }
 0x43a   :  { %3083 = vmatpush2.bf16.msra.mxu0 %v4166_v39  ;;  %v4233_v39 = vld [vmem:[#allocation3 + $0x398] ss:$28 sps:$4 sm:$0xff]  }
 0x43b   :  { %3136 = vmatpush2.bf16.msra.mxu1 %v4169_v18  ;;  %3084 = vmatprep.subr.bf16.mxu0 %v4174_v10  ;;  %v5121_v18 = vld [vmem:[%s5154_s14] sm:$0xff]  ;;  %s4497_s14 = smov [#allocation17]  }
 0x43c   :  { %3137 = vmatprep.subr.bf16.mxu1 %v4177_v34  ;;  %v1666_v10 = vrot.slane %v5121_v18, %v4631_v56  ;;  %s3327_s21 = sshll.u32 %s4497_s14, 4  ;;  %s3328_s21 = int_to_ptr.vmem [resolvable:$true] %s3327_s21 }
 0x43d   :  { %s4450_s0 = scalar_lea.vmem %s3328_s21, 3584  ;;  %p4455_p13 = scmp.lt.s32.totalorder %s3328_s21, %s3328_s21 }
 0x43e   :  { %3085 = vmatpush2.bf16.msra.mxu0 %v4172_v58  ;;  %p4451_p12 = scmp.ne.s32.totalorder %s3328_s21, %s4450_s0  ;;  %p4456_p0 = scmp.lt.s32.totalorder %s4450_s0, %s4450_s0 }
 0x43f   :  { %3138 = vmatpush2.bf16.msra.mxu1 %v4175_v6  ;;  %3086 = vmatprep.subr.bf16.mxu0 %v4180_v7 }
 0x440   :  { %3139 = vmatprep.subr.bf16.mxu1 %v4183_v37  ;;  %p4457_p1 = por %p4456_p0, %p4455_p13 }
 0x442   :  { %3087 = vmatpush2.bf16.msra.mxu0 %v4178_v12  ;;  %p4458_p2 = pnand %p4457_p1, %p4451_p12 }
 0x443   :  { %3140 = vmatpush2.bf16.msra.mxu1 %v4181_v52  ;;  %3088 = vmatprep.subr.bf16.mxu0 %v4186_v28 }
 0x444   :  { %3141 = vmatprep.subr.bf16.mxu1 %v4189_v9 }
 0x446   :  { %3089 = vmatpush2.bf16.msra.mxu0 %v4184_v29 }
 0x447   :  { %3142 = vmatpush2.bf16.msra.mxu1 %v4187_v31  ;;  %3090 = vmatprep.subr.bf16.mxu0 %v4192_v33 }
 0x448   :  { %3143 = vmatprep.subr.bf16.mxu1 %v4195_v4 }
 0x44a   :  { %3091 = vmatpush2.bf16.msra.mxu0 %v4190_v41 }
 0x44b   :  { %3144 = vmatpush2.bf16.msra.mxu1 %v4193_v45  ;;  %3092 = vmatprep.subr.bf16.mxu0 %v4198_v46 }
 0x44c   :  { %3145 = vmatprep.subr.bf16.mxu1 %v4201_v0 }
 0x44e   :  { %3093 = vmatpush2.bf16.msra.mxu0 %v4196_v2 }
 0x44f   :  { %3146 = vmatpush2.bf16.msra.mxu1 %v4199_v15  ;;  %3680 = vmatprep.subr.bf16.mxu0 %v4202_v16 }
 0x450   :  { %3708 = vmatprep.subr.bf16.mxu1 %v4203_v57 }
 0x451   :  { %3095 = vmatmul.mubr.bf16.vlgmr.msra.gmra.mxu0 %v5046_v49 }
 0x452   :  { %3148 = vmatmul.mubr.bf16.vlgmr.msra.gmra.mxu1 %v5054_v50  ;;  %3681 = vmatpush3.bf16.msra.mxu0 %v4204_v63 }
 0x453   :  { %3709 = vmatpush3.bf16.msra.mxu1 %v4205_v43  ;;  %3682 = vmatprep.subr.bf16.mxu0 %v4206_v14 }
 0x454   :  { %3710 = vmatprep.subr.bf16.mxu1 %v4207_v17  ;;  %3104 = vmatprep.mubr.bf16.mxu0 %v5062_v25 }
 0x455   :  { %3157 = vmatprep.mubr.bf16.mxu1 %v5070_v62 }
 0x456   :  { %3683 = vmatpush3.bf16.msra.mxu0 %v4208_v13 }
 0x457   :  { %3711 = vmatpush3.bf16.msra.mxu1 %v4209_v35  ;;  %3684 = vmatprep.subr.bf16.mxu0 %v4210_v36 }
 0x458   :  { %3712 = vmatprep.subr.bf16.mxu1 %v4211_v5 }
 0x459   :  { %3105 = vmatmul.mubr.bf16.gmra.mxu0 %v5082_v38 }
 0x45a   :  { %3158 = vmatmul.mubr.bf16.gmra.mxu1 %v5090_v3  ;;  %3685 = vmatpush3.bf16.msra.mxu0 %v4212_v48 }
 0x45b   :  { %3713 = vmatpush3.bf16.msra.mxu1 %v4213_v51  ;;  %3686 = vmatprep.subr.bf16.mxu0 %v4214_v20 }
 0x45c   :  { %3714 = vmatprep.subr.bf16.mxu1 %v4215_v53  ;;  %3200 = vmatprep.mubr.bf16.mxu0 %v5034_v61  ;;  %v4228_v61 = vld [vmem:[#allocation3 + $0x50] ss:$28 sps:$4 sm:$0xff]  }
 0x45d   :  { %3249 = vmatprep.mubr.bf16.mxu1 %v5036_v26  ;;  %v4229_v26 = vld [vmem:[#allocation3 + $0x3d0] ss:$28 sps:$4 sm:$0xff]  }
 0x45e   :  { %3687 = vmatpush3.bf16.msra.mxu0 %v4216_v42  ;;  %v1674_v42 = vrot.slane %v5121_v18, %v4768_v60 }
 0x45f   :  { %3715 = vmatpush3.bf16.msra.mxu1 %v4217_v24  ;;  %3688 = vmatprep.subr.bf16.mxu0 %v4218_v40  ;;  %v1678_v24 = vrot.slane %v5121_v18, %v4774_v1 }
 0x460   :  { %3716 = vmatprep.subr.bf16.mxu1 %v4219_v22 }
 0x462   :  { %3689 = vmatpush3.bf16.msra.mxu0 %v4220_v30 }
 0x463   :  { %3717 = vmatpush3.bf16.msra.mxu1 %v4221_v8  ;;  %3690 = vmatprep.subr.bf16.mxu0 %v4222_v19 }
 0x464   :  { %3718 = vmatprep.subr.bf16.mxu1 %v4223_v44 }
 0x466   :  { %3691 = vmatpush3.bf16.msra.mxu0 %v4224_v27 }
 0x467   :  { %3719 = vmatpush3.bf16.msra.mxu1 %v4225_v23  ;;  %3692 = vmatprep.subr.bf16.mxu0 %v4226_v32 }
 0x468   :  { %3720 = vmatprep.subr.bf16.mxu1 %v4227_v47 }
 0x46a   :  { %3693 = vmatpush3.bf16.msra.mxu0 %v4228_v61 }
 0x46b   :  { %3721 = vmatpush3.bf16.msra.mxu1 %v4229_v26  ;;  %3694 = vmatprep.subr.bf16.mxu0 %v4230_v54 }
 0x46c   :  { %3722 = vmatprep.subr.bf16.mxu1 %v4231_v21 }
 0x46e   :  { %3695 = vmatpush3.bf16.msra.mxu0 %v4232_v11 }
 0x46f   :  { %3723 = vmatpush3.bf16.msra.mxu1 %v4233_v39 }
 0x471   :  { %3201 = vmatmul.mubr.bf16.vlgmr.msra.gmra.mxu0 %v5046_v49  ;;  %v1670_v49 = vrot.slane %v5121_v18, %v4636_v59 }
 0x472   :  { %3250 = vmatmul.mubr.bf16.vlgmr.msra.gmra.mxu1 %v5054_v50  ;;  %3208 = vmatprep.mubr.bf16.mxu0 %v5062_v25 }
 0x473   :  { %3257 = vmatprep.mubr.bf16.mxu1 %v5070_v62 }
 0x479   :  { %3209 = vmatmul.mubr.bf16.gmra.mxu0 %v5082_v38 }
 0x47a   :  { %3258 = vmatmul.mubr.bf16.gmra.mxu1 %v5090_v3 }
 0x491   :  { %v2884_v50 = vpop.f32.mrf.mxu0 }
 0x492   :  { %v2937_v34 = vpop.f32.mrf.mxu1  ;;  %v2885_v25 = vadd.f32 %v2884_v50, %v1666_v10 }
 0x493   :  { %v2886_v58 = vpop.f32.mrf.mxu0 }
 0x494   :  { %v2939_v62 = vpop.f32.mrf.mxu1  ;;  %v2938_v6 = vadd.f32 %v2937_v34, %v2885_v25  ;;  %v2887_v38 = vadd.f32 %v2886_v58, %v1670_v49 }
 0x495   :  { %v2888_v7 = vpop.f32.mrf.mxu0 }
 0x496   :  { %v2941_v3 = vpop.f32.mrf.mxu1  ;;  %4234 = vtanh.f32 %v2938_v6  ;;  %v2940_v37 = vadd.f32 %v2939_v62, %v2887_v38  ;;  %v2889_v12 = vadd.f32 %v2888_v7, %v1666_v10 }
 0x497   :  { %v2890_v52 = vpop.f32.mrf.mxu0 }
 0x498   :  { %v2943_v28 = vpop.f32.mrf.mxu1  ;;  %4236 = vtanh.f32 %v2940_v37  ;;  %v2942_v9 = vadd.f32 %v2941_v3, %v2889_v12  ;;  %v2891_v56 = vadd.f32 %v2890_v52, %v1670_v49 }
 0x499   :  { %v2894_v29 = vpop.f32.mrf.mxu0 }
 0x49a   :  { %v2947_v31 = vpop.f32.mrf.mxu1  ;;  %4238 = vtanh.f32 %v2942_v9  ;;  %v2944_v59 = vadd.f32 %v2943_v28, %v2891_v56  ;;  %v2895_v33 = vadd.f32 %v2894_v29, %v1666_v10 }
 0x49b   :  { %v2896_v4 = vpop.f32.mrf.mxu0 }
 0x49c   :  { %v2949_v41 = vpop.f32.mrf.mxu1  ;;  %4240 = vtanh.f32 %v2944_v59  ;;  %v2897_v45 = vadd.f32 %v2896_v4, %v1670_v49  ;;  %v2948_v46 = vadd.f32 %v2947_v31, %v2895_v33 }
 0x49d   :  { %v2898_v0 = vpop.f32.mrf.mxu0 }
 0x49e   :  { %v2951_v2 = vpop.f32.mrf.mxu1  ;;  %4242 = vtanh.f32 %v2948_v46  ;;  %v2899_v15 = vadd.f32 %v2898_v0, %v1666_v10  ;;  %v2950_v16 = vadd.f32 %v2949_v41, %v2897_v45  ;;  %v1681_v41 = vsub.s32 4, %v4628_v55 }
 0x49f   :  { %v2900_v57 = vpop.f32.mrf.mxu0  ;;  %v1685_v45 = vsub.s32 5, %v4628_v55 }
 0x4a0   :  { %v2953_v63 = vpop.f32.mrf.mxu1  ;;  %4244 = vtanh.f32 %v2950_v16  ;;  %v2901_v43 = vadd.f32 %v2900_v57, %v1670_v49  ;;  %v2952_v14 = vadd.f32 %v2951_v2, %v2899_v15  ;;  %v1682_v46 = vrot.slane %v5121_v18, %v1681_v41 }
 0x4a1   :  { %v1686_v0 = vrot.slane %v5121_v18, %v1685_v45 }
 0x4a2   :  { %4246 = vtanh.f32 %v2952_v14  ;;  %v2954_v17 = vadd.f32 %v2953_v63, %v2901_v43 }
 0x4a3   :  { %v4235_v13 = vpop.eup %4234 }
 0x4a4   :  { %3294 = vst [vmem:[#allocation17] sm:$0xff] %v4235_v13  ;;  %4248 = vtanh.f32 %v2954_v17 }
 0x4a5   :  { %v4237_v35 = vpop.eup %4236 }
 0x4a6   :  { %3295 = vst [vmem:[#allocation17 + $0x8] sm:$0xff] %v4237_v35 }
 0x4a7   :  { %v4239_v36 = vpop.eup %4238 }
 0x4a8   :  { %3301 = vst [vmem:[#allocation17 + $0x38] sm:$0xff] %v4239_v36 }
 0x4a9   :  { %v4241_v5 = vpop.eup %4240 }
 0x4aa   :  { %3302 = vst [vmem:[#allocation17 + $0x40] sm:$0xff] %v4241_v5 }
 0x4ab   :  { %v4243_v48 = vpop.eup %4242 }
 0x4ac   :  { %3308 = vst [vmem:[#allocation17 + $0x70] sm:$0xff] %v4243_v48 }
 0x4ad   :  { %v4245_v51 = vpop.eup %4244 }
 0x4ae   :  { %3309 = vst [vmem:[#allocation17 + $0x78] sm:$0xff] %v4245_v51 }
 0x4af   :  { %v4247_v20 = vpop.eup %4246 }
 0x4b0   :  { %3315 = vst [vmem:[#allocation17 + $0xa8] sm:$0xff] %v4247_v20 }
 0x4b1   :  { %v4249_v53 = vpop.eup %4248 }
 0x4b2   :  { %3316 = vst [vmem:[#allocation17 + $0xb0] sm:$0xff] %v4249_v53 }
 0x4d1   :  { %v2990_v40 = vpop.f32.mrf.mxu0 }
 0x4d2   :  { %v3043_v22 = vpop.f32.mrf.mxu1  ;;  %v2991_v30 = vadd.f32 %v2990_v40, %v1674_v42 }
 0x4d3   :  { %v2992_v8 = vpop.f32.mrf.mxu0 }
 0x4d4   :  { %v3045_v19 = vpop.f32.mrf.mxu1  ;;  %v3044_v44 = vadd.f32 %v3043_v22, %v2991_v30  ;;  %v2993_v27 = vadd.f32 %v2992_v8, %v1678_v24 }
 0x4d5   :  { %v2994_v23 = vpop.f32.mrf.mxu0 }
 0x4d6   :  { %v3047_v32 = vpop.f32.mrf.mxu1  ;;  %4250 = vtanh.f32 %v3044_v44  ;;  %v3046_v47 = vadd.f32 %v3045_v19, %v2993_v27  ;;  %v2995_v61 = vadd.f32 %v2994_v23, %v1674_v42 }
 0x4d7   :  { %v2996_v26 = vpop.f32.mrf.mxu0 }
 0x4d8   :  { %v3049_v54 = vpop.f32.mrf.mxu1  ;;  %4252 = vtanh.f32 %v3046_v47  ;;  %v3048_v21 = vadd.f32 %v3047_v32, %v2995_v61  ;;  %v2997_v60 = vadd.f32 %v2996_v26, %v1678_v24 }
 0x4d9   :  { %v3000_v11 = vpop.f32.mrf.mxu0 }
 0x4da   :  { %v3053_v39 = vpop.f32.mrf.mxu1  ;;  %4254 = vtanh.f32 %v3048_v21  ;;  %v3050_v1 = vadd.f32 %v3049_v54, %v2997_v60  ;;  %v3001_v10 = vadd.f32 %v3000_v11, %v1674_v42 }
 0x4db   :  { %v3002_v49 = vpop.f32.mrf.mxu0 }
 0x4dc   :  { %v3055_v50 = vpop.f32.mrf.mxu1  ;;  %4256 = vtanh.f32 %v3050_v1  ;;  %v3003_v34 = vadd.f32 %v3002_v49, %v1678_v24  ;;  %v3054_v25 = vadd.f32 %v3053_v39, %v3001_v10 }
 0x4dd   :  { %v3004_v58 = vpop.f32.mrf.mxu0 }
 0x4de   :  { %v3057_v62 = vpop.f32.mrf.mxu1  ;;  %4258 = vtanh.f32 %v3054_v25  ;;  %v3005_v6 = vadd.f32 %v3004_v58, %v1674_v42  ;;  %v3056_v38 = vadd.f32 %v3055_v50, %v3003_v34  ;;  %v1689_v50 = vsub.s32 6, %v4628_v55 }
 0x4df   :  { %v3006_v7 = vpop.f32.mrf.mxu0 }
 0x4e0   :  { %v3059_v3 = vpop.f32.mrf.mxu1  ;;  %4260 = vtanh.f32 %v3056_v38  ;;  %v3007_v37 = vadd.f32 %v3006_v7, %v1678_v24  ;;  %v3058_v12 = vadd.f32 %v3057_v62, %v3005_v6  ;;  %v1690_v6 = vrot.slane %v5121_v18, %v1689_v50 }
 0x4e2   :  { %4262 = vtanh.f32 %v3058_v12  ;;  %v3060_v52 = vadd.f32 %v3059_v3, %v3007_v37 }
 0x4e3   :  { %v4251_v28 = vpop.eup %4250 }
 0x4e4   :  { %3296 = vst [vmem:[#allocation17 + $0x10] sm:$0xff] %v4251_v28  ;;  %4264 = vtanh.f32 %v3060_v52 }
 0x4e5   :  { %v4253_v9 = vpop.eup %4252 }
 0x4e6   :  { %3297 = vst [vmem:[#allocation17 + $0x18] sm:$0xff] %v4253_v9 }
 0x4e7   :  { %v4255_v56 = vpop.eup %4254 }
 0x4e8   :  { %3303 = vst [vmem:[#allocation17 + $0x48] sm:$0xff] %v4255_v56 }
 0x4e9   :  { %v4257_v29 = vpop.eup %4256 }
 0x4ea   :  { %3304 = vst [vmem:[#allocation17 + $0x50] sm:$0xff] %v4257_v29 }
 0x4eb   :  { %v4259_v31 = vpop.eup %4258 }
 0x4ec   :  { %3310 = vst [vmem:[#allocation17 + $0x80] sm:$0xff] %v4259_v31 }
 0x4ed   :  { %v4261_v59 = vpop.eup %4260 }
 0x4ee   :  { %3311 = vst [vmem:[#allocation17 + $0x88] sm:$0xff] %v4261_v59 }
 0x4ef   :  { %v4263_v33 = vpop.eup %4262 }
 0x4f0   :  { %3317 = vst [vmem:[#allocation17 + $0xb8] sm:$0xff] %v4263_v33 }
 0x4f1   :  { %v4265_v4 = vpop.eup %4264 }
 0x4f2   :  { %3318 = vst [vmem:[#allocation17 + $0xc0] sm:$0xff] %v4265_v4 }
 0x511   :  { %v3096_v2 = vpop.f32.mrf.mxu0 }
 0x512   :  { %v3149_v15 = vpop.f32.mrf.mxu1  ;;  %v3097_v16 = vadd.f32 %v3096_v2, %v1682_v46 }
 0x513   :  { %v3098_v57 = vpop.f32.mrf.mxu0 }
 0x514   :  { %v3151_v63 = vpop.f32.mrf.mxu1  ;;  %v3150_v43 = vadd.f32 %v3149_v15, %v3097_v16  ;;  %v3099_v14 = vadd.f32 %v3098_v57, %v1686_v0 }
 0x515   :  { %v3100_v17 = vpop.f32.mrf.mxu0 }
 0x516   :  { %v3153_v13 = vpop.f32.mrf.mxu1  ;;  %4266 = vtanh.f32 %v3150_v43  ;;  %v3152_v35 = vadd.f32 %v3151_v63, %v3099_v14  ;;  %v3101_v36 = vadd.f32 %v3100_v17, %v1682_v46 }
 0x517   :  { %v3102_v5 = vpop.f32.mrf.mxu0 }
 0x518   :  { %v3155_v48 = vpop.f32.mrf.mxu1  ;;  %4268 = vtanh.f32 %v3152_v35  ;;  %v3154_v51 = vadd.f32 %v3153_v13, %v3101_v36  ;;  %v3103_v20 = vadd.f32 %v3102_v5, %v1686_v0 }
 0x519   :  { %v3106_v53 = vpop.f32.mrf.mxu0 }
 0x51a   :  { %v3159_v42 = vpop.f32.mrf.mxu1  ;;  %4270 = vtanh.f32 %v3154_v51  ;;  %v3156_v24 = vadd.f32 %v3155_v48, %v3103_v20  ;;  %v3107_v40 = vadd.f32 %v3106_v53, %v1682_v46 }
 0x51b   :  { %v3108_v22 = vpop.f32.mrf.mxu0 }
 0x51c   :  { %v3161_v30 = vpop.f32.mrf.mxu1  ;;  %4272 = vtanh.f32 %v3156_v24  ;;  %v3109_v8 = vadd.f32 %v3108_v22, %v1686_v0  ;;  %v3160_v19 = vadd.f32 %v3159_v42, %v3107_v40 }
 0x51d   :  { %v3110_v44 = vpop.f32.mrf.mxu0 }
 0x51e   :  { %v3163_v27 = vpop.f32.mrf.mxu1  ;;  %4274 = vtanh.f32 %v3160_v19  ;;  %v3111_v23 = vadd.f32 %v3110_v44, %v1682_v46  ;;  %v3162_v32 = vadd.f32 %v3161_v30, %v3109_v8 }
 0x51f   :  { %v3112_v47 = vpop.f32.mrf.mxu0 }
 0x520   :  { %v3165_v61 = vpop.f32.mrf.mxu1  ;;  %4276 = vtanh.f32 %v3162_v32  ;;  %v3113_v26 = vadd.f32 %v3112_v47, %v1686_v0  ;;  %v3164_v54 = vadd.f32 %v3163_v27, %v3111_v23 }
 0x522   :  { %4278 = vtanh.f32 %v3164_v54  ;;  %v3166_v21 = vadd.f32 %v3165_v61, %v3113_v26 }
 0x523   :  { %v4267_v60 = vpop.eup %4266 }
 0x524   :  { %3298 = vst [vmem:[#allocation17 + $0x20] sm:$0xff] %v4267_v60  ;;  %4280 = vtanh.f32 %v3166_v21 }
 0x525   :  { %v4269_v11 = vpop.eup %4268 }
 0x526   :  { %3299 = vst [vmem:[#allocation17 + $0x28] sm:$0xff] %v4269_v11 }
 0x527   :  { %v4271_v39 = vpop.eup %4270 }
 0x528   :  { %3305 = vst [vmem:[#allocation17 + $0x58] sm:$0xff] %v4271_v39 }
 0x529   :  { %v4273_v1 = vpop.eup %4272 }
 0x52a   :  { %3306 = vst [vmem:[#allocation17 + $0x60] sm:$0xff] %v4273_v1 }
 0x52b   :  { %v4275_v10 = vpop.eup %4274 }
 0x52c   :  { %3312 = vst [vmem:[#allocation17 + $0x90] sm:$0xff] %v4275_v10 }
 0x52d   :  { %v4277_v49 = vpop.eup %4276 }
 0x52e   :  { %3313 = vst [vmem:[#allocation17 + $0x98] sm:$0xff] %v4277_v49 }
 0x52f   :  { %v4279_v34 = vpop.eup %4278 }
 0x530   :  { %3319 = vst [vmem:[#allocation17 + $0xc8] sm:$0xff] %v4279_v34 }
 0x531   :  { %v4281_v25 = vpop.eup %4280  ;;  %v3696_v58 = vpop.f32.mrf.mxu0 }
 0x532   :  { %v3724_v62 = vpop.f32.mrf.mxu1  ;;  %3320 = vst [vmem:[#allocation17 + $0xd0] sm:$0xff] %v4281_v25 }
 0x533   :  { %v3697_v38 = vpop.f32.mrf.mxu0 }
 0x534   :  { %v3725_v7 = vpop.f32.mrf.mxu1  ;;  %v3698_v3 = vadd.f32 %v3697_v38, %v3696_v58 }
 0x535   :  { %v3699_v37 = vpop.f32.mrf.mxu0  ;;  %v3726_v28 = vadd.f32 %v3725_v7, %v3724_v62 }
 0x536   :  { %v3727_v12 = vpop.f32.mrf.mxu1  ;;  %v3203_v52 = vadd.f32 %v3698_v3, %v1690_v6 }
 0x537   :  { %v3700_v9 = vpop.f32.mrf.mxu0 }
 0x538   :  { %v3728_v56 = vpop.f32.mrf.mxu1  ;;  %v3252_v29 = vadd.f32 %v3726_v28, %v3203_v52  ;;  %v3701_v31 = vadd.f32 %v3700_v9, %v3699_v37 }
 0x539   :  { %v3702_v55 = vpop.f32.mrf.mxu0  ;;  %v3729_v4 = vadd.f32 %v3728_v56, %v3727_v12 }
 0x53a   :  { %v3730_v59 = vpop.f32.mrf.mxu1  ;;  %4282 = vtanh.f32 %v3252_v29  ;;  %v3206_v33 = vadd.f32 %v3701_v31, %v1690_v6 }
 0x53b   :  { %v3703_v41 = vpop.f32.mrf.mxu0 }
 0x53c   :  { %v3731_v45 = vpop.f32.mrf.mxu1  ;;  %v3255_v46 = vadd.f32 %v3729_v4, %v3206_v33  ;;  %v3704_v18 = vadd.f32 %v3703_v41, %v3702_v55 }
 0x53d   :  { %v3705_v0 = vpop.f32.mrf.mxu0  ;;  %v3732_v16 = vadd.f32 %v3731_v45, %v3730_v59 }
 0x53e   :  { %v3733_v2 = vpop.f32.mrf.mxu1  ;;  %4284 = vtanh.f32 %v3255_v46  ;;  %v3211_v15 = vadd.f32 %v3704_v18, %v1690_v6 }
 0x53f   :  { %v3706_v57 = vpop.f32.mrf.mxu0 }
 0x540   :  { %v3734_v63 = vpop.f32.mrf.mxu1  ;;  %v3260_v43 = vadd.f32 %v3732_v16, %v3211_v15  ;;  %v3707_v14 = vadd.f32 %v3706_v57, %v3705_v0 }
 0x541   :  { %v3735_v13 = vadd.f32 %v3734_v63, %v3733_v2 }
 0x542   :  { %4286 = vtanh.f32 %v3260_v43  ;;  %v3214_v17 = vadd.f32 %v3707_v14, %v1690_v6 }
 0x544   :  { %v3263_v35 = vadd.f32 %v3735_v13, %v3214_v17 }
 0x546   :  { %4288 = vtanh.f32 %v3263_v35 }
 0x547   :  { %v4283_v36 = vpop.eup %4282 }
 0x548   :  { %3300 = vst [vmem:[#allocation17 + $0x30] sm:$0xff] %v4283_v36 }
 0x54b   :  { %v4285_v5 = vpop.eup %4284 }
 0x54c   :  { %3307 = vst [vmem:[#allocation17 + $0x68] sm:$0xff] %v4285_v5 }
 0x54f   :  { %v4287_v48 = vpop.eup %4286 }
 0x550   :  { %3314 = vst [vmem:[#allocation17 + $0xa0] sm:$0xff] %v4287_v48 }
 0x553   :  { %v4289_v51 = vpop.eup %4288 }
 0x554   :  { %3321 = vst [vmem:[#allocation17 + $0xd8] sm:$0xff] %v4289_v51 }
 0x555   :  { %4461 = shalt.err (!%p4458_p2)
}
 0x556   :  { %s4498_s23 = smov 896   ;;  %s4499_s24 = smov 56  }
 0x557   :  { %3333 = dma.vmem_to_hbm [thread:$0]  %s3328_s21, 3584, %s5155_s15, [#allocation8], %s4498_s23, %s4498_s23, %s4499_s24  }
 0x558   :  { %4482 = dma.done.wait [#allocation8], 3584  }
 0x559   :  { %4483 = vsyncadd [#allocation8], 4294963712 }
 0x55a   :  { %3337 = vsyncpa [#allocation7], 1 }
 0x55b   :  { %3338 = vsyncpa [#allocation10], 1 }
 0x55c   :  { %3339 = vsyncpa [#allocation13], 1 }
 0x55d   :  { %3340 = vsyncpa [#allocation16], 1 }
 0x55e   :  { %3341 = vsyncpa [#allocation8], 1 }
 0x55f   :  { %3342 = vsyncmov [#allocation4] }
 0x562   :  { %s3343_s27 = vpop.sfrf %3342 }
 0x563   :  { %p3668_p3 = scmp.ne.s32.totalorder %s3343_s27, 0 }
 0x565   :  { %3347 = shalt.err (%p3668_p3)  }
 0x566   :  { %3349 = vsyncmov [#allocation4 + $0x1] }
 0x569   :  { %s3350_s28 = vpop.sfrf %3349 }
 0x56a   :  { %p3669_p4 = scmp.ne.s32.totalorder %s3350_s28, 0 }
 0x56c   :  { %3354 = shalt.err (%p3669_p4)  }

</bundles_post_ra>
